<compile_context>
chip_gen: v6e
topology: v6e:2x2x1
jax: 0.10.0
libtpu: 0.0.40
codegen_flags: <defaults>
</compile_context>

<pallas_src>
import jax
import jax.numpy as jnp
from jax import lax
from jax.experimental import pallas as pl
from jax.experimental.pallas import tpu as pltpu


# Exceptions for which falling back from the single-buffered (Buffered(1)) build to
# the default double-buffered build is legitimate.  Anything else propagates.
_errs = [pltpu.LoweringException, NotImplementedError, ValueError, TypeError]
_jre = getattr(getattr(jax, "errors", None), "JaxRuntimeError", None)
if _jre is not None:
    _errs.append(_jre)
_SINGLE_BUFFER_FALLBACK_ERRORS = tuple(_errs)


def _vmem_capacity_bytes():
    try:
        return int(pltpu.get_tpu_info().vmem_capacity_bytes)
    except Exception:
        return 64 * 1024 * 1024   # conservative: v7x per-TensorCore VMEM


def _layernorm(x, gamma, beta, eps=1e-5):
    mu = jnp.mean(x, axis=-1, keepdims=True)
    var = jnp.mean((x - mu) ** 2, axis=-1, keepdims=True)
    return (x - mu) * lax.rsqrt(var + eps) * gamma + beta


def encoder_kernel(x_q_ref, x_full_ref, mask_ref,
                   ln1_g, ln1_b, w_q, b_q, w_kv, b_kv, w_o, b_o,
                   ln2_g, ln2_b, w1, b1, w2, b2,
                   o_ref, k_scr, v_scr, attn_scr):
    qi = pl.program_id(1)
    n_head, S, hd = k_scr.shape
    TQ, D = x_q_ref.shape[1], x_q_ref.shape[2]
    n_ffn_chunks = w1.shape[0]
    scale = 1.0 / (hd ** 0.5)

    # ---- K/V for the whole sequence: one fused (S,D)x(D,2D) matmul per batch,
    #      cached head-major bf16 in VMEM scratch and reused by every q-tile.
    @pl.when(qi == 0)
    def _():
        xn = _layernorm(x_full_ref[0], ln1_g[...], ln1_b[...])          # f32 (S, D)
        kv = (jnp.dot(xn.astype(jnp.bfloat16), w_kv[...],
                      preferred_element_type=jnp.float32) + b_kv[...])  # (S, 2D) f32
        for h in range(n_head):                                         # static slices
            k_scr[h] = kv[:, h * hd:(h + 1) * hd].astype(jnp.bfloat16)
            v_scr[h] = kv[:, D + h * hd:D + (h + 1) * hd].astype(jnp.bfloat16)

    # ---- pre-LN multi-head self-attention on this q-tile ----
    x_q = x_q_ref[0]                                                    # f32 (TQ, D)
    xn1b = _layernorm(x_q, ln1_g[...], ln1_b[...]).astype(jnp.bfloat16)
    # Full-width Q projection; fold the 1/sqrt(hd) scale in before the bf16 cast.
    q_all = ((jnp.dot(xn1b, w_q[...], preferred_element_type=jnp.float32)
              + b_q[...]) * scale).astype(jnp.bfloat16)                 # (TQ, D) bf16
    mask_row = mask_ref[0]                                              # (1, S) f32

    # Static head loop: each head's (TQ,S) score tile is consumed by the attn_scr
    # store before the next head starts, so live ranges stay bounded despite unroll.
    for h in range(n_head):
        qh = q_all[:, h * hd:(h + 1) * hd]                              # (TQ, hd) bf16
        s = lax.dot_general(qh, k_scr[h],                               # (TQ, S) f32
                            dimension_numbers=(((1,), (1,)), ((), ())),
                            preferred_element_type=jnp.float32)
        s = s + mask_row                                                # (1,S) broadcast
        m = jnp.max(s, axis=-1, keepdims=True)
        p = jnp.exp(s - m)                                              # f32 softmax
        p = p * pl.reciprocal(jnp.sum(p, axis=-1, keepdims=True), approx=True)
        oh = jnp.dot(p.astype(jnp.bfloat16), v_scr[h],
                     preferred_element_type=jnp.float32)                # (TQ, hd)
        attn_scr[:, h * hd:(h + 1) * hd] = oh.astype(jnp.bfloat16)      # head-blocked

    # Single full-width (K=D) output projection over the concatenated heads.
    attn = jnp.dot(attn_scr[...], w_o[...], preferred_element_type=jnp.float32)
    x_res = x_q + attn + b_o[...]               # attn_dropout == identity (eval)

    # ---- pre-LN feed-forward, chunked over the intermediate dimension ----
    xn2b = _layernorm(x_res, ln2_g[...], ln2_b[...]).astype(jnp.bfloat16)

    def ffn_body(c, acc):
        h1 = jnp.maximum(
            jnp.dot(xn2b, w1[c], preferred_element_type=jnp.float32) + b1[c], 0.0)
        return acc + jnp.dot(h1.astype(jnp.bfloat16), w2[c],
                             preferred_element_type=jnp.float32)

    ff = lax.fori_loop(0, n_ffn_chunks, ffn_body,
                       jnp.zeros((TQ, D), jnp.float32),
                       unroll=True if n_ffn_chunks <= 4 else 2)
    o_ref[0] = x_res + ff + b2[...]             # dropout1 / dropout2 == identity (eval)


def preln_encoder(x, inp_len, params, n_head):
    B, S, D = x.shape
    assert D % n_head == 0
    hd = D // n_head

    # key_padding_mask: True (pad) where pos >= inp_len -> additive -inf mask (f32 row)
    pos = jnp.arange(S)[None, :]
    add_mask = jnp.where(pos >= inp_len[:, None], -1e30, 0.0)
    add_mask = add_mask.astype(jnp.float32).reshape(B, 1, S)

    # ---- weight packing: fused full-width projections, bf16 MXU operands ----
    w_qkv = params["w_qkv"]                          # (D, 3D)
    b_qkv = params["b_qkv"].reshape(-1)              # (3D,)
    w_q = w_qkv[:, :D].astype(jnp.bfloat16)          # (D, D)
    b_q = b_qkv[:D].reshape(1, D).astype(jnp.float32)
    w_kv = w_qkv[:, D:].astype(jnp.bfloat16)         # (D, 2D)  fused K|V projection
    b_kv = b_qkv[D:].reshape(1, 2 * D).astype(jnp.float32)
    w_o = params["w_o"].astype(jnp.bfloat16)         # (D, D)   head-blocked rows
    b_o = params["b_o"].astype(jnp.float32)          # (1, D)

    I = params["w1"].shape[1]
    chunk = 512 if (I > 512 and I % 512 == 0) else I
    n_chunks = I // chunk
    w1 = jnp.transpose(params["w1"].reshape(D, n_chunks, chunk),
                       (1, 0, 2)).astype(jnp.bfloat16)                  # (NC, D, C)
    b1 = params["b1"].reshape(n_chunks, 1, chunk).astype(jnp.float32)
    w2 = params["w2"].reshape(n_chunks, chunk, D).astype(jnp.bfloat16)  # (NC, C, D)
    b2 = params["b2"].astype(jnp.float32)                               # (1, D)

    weights = (params["ln1_g"].astype(jnp.float32), params["ln1_b"].astype(jnp.float32),
               w_q, b_q, w_kv, b_kv, w_o, b_o,
               params["ln2_g"].astype(jnp.float32), params["ln2_b"].astype(jnp.float32),
               w1, b1, w2, b2)

    cap = _vmem_capacity_bytes()

    # ---- honest VMEM estimate: what actually lives in VMEM per grid step ----
    def est_vmem(tq, single_buf):
        wmul = 1 if single_buf else 2
        weights_b = wmul * sum(int(w.size) * w.dtype.itemsize for w in weights)
        x_full_b = wmul * S * D * 4               # full-seq x tile (K/V fill path)
        io_tiles = 2 * (2 * tq * D * 4)           # double-buffered x_q in + out tiles
        mask_b = 2 * S * 4
        kv_scratch = 2 * n_head * S * hd * 2      # bf16 K and V caches
        attn_b = tq * D * 2                       # bf16 head-concat buffer
        live = (2 * tq * S * 4                    # score + exp tile (one head live)
                + 3 * tq * D * 4                  # q_all / residual / FFN accumulator
                + tq * chunk * 4                  # FFN intermediate chunk
                + S * D * 4)                      # LN(x_full) transient at qi==0
        return weights_b + x_full_b + io_tiles + mask_b + kv_scratch + attn_b + live

    # ---- q-row tiling: largest of {256,128} dividing S that fits the budget ----
    if S <= 256:
        TQ = S
    else:
        choices = [t for t in (256, 128) if S % t == 0]
        if not choices:
            TQ = S                                # irregular S: no row tiling
        else:
            TQ = choices[-1]                      # tightest default (v7x safety)
            for t in choices:
                if est_vmem(t, True) <= int(cap * 0.85):
                    TQ = t
                    break
    n_qt = S // TQ

    def vmem_limit(single_buf):
        est = est_vmem(TQ, single_buf)
        # never exceed physical capacity (v7x: 64 MiB per TensorCore)
        return int(min(cap * 98 // 100, max(32 * 1024 * 1024, int(est * 1.4))))

    act_spec_q = pl.BlockSpec((1, TQ, D), lambda b, q: (b, q, 0))
    mask_spec = pl.BlockSpec((1, 1, S), lambda b, q: (b, 0, 0))
    out_spec = pl.BlockSpec((1, TQ, D), lambda b, q: (b, q, 0))

    def build(single_buf):
        extra = {"pipeline_mode": pl.Buffered(1)} if single_buf else {}
        x_full_spec = pl.BlockSpec((1, S, D), lambda b, q: (b, 0, 0), **extra)

        def wspec(a):
            return pl.BlockSpec(a.shape, lambda b, q, _n=a.ndim: (0,) * _n, **extra)

        # NOTE: the q axis must stay "arbitrary" (sequential) — the qi==0 K/V fill
        # relies on it.  Batch is the megacore split.
        # TODO(synk): with B==1 one v7x TensorCore idles; a core_map split with K/V
        # recomputed per core (or shared via VMEM_SHARED) would recover that 2x.
        return pl.pallas_call(
            encoder_kernel,
            out_shape=jax.ShapeDtypeStruct((B, S, D), jnp.float32),
            grid_spec=pltpu.PrefetchScalarGridSpec(
                num_scalar_prefetch=0,
                grid=(B, n_qt),
                in_specs=[act_spec_q, x_full_spec, mask_spec]
                         + [wspec(w) for w in weights],
                out_specs=out_spec,
                scratch_shapes=[pltpu.VMEM((n_head, S, hd), jnp.bfloat16),   # K cache
                                pltpu.VMEM((n_head, S, hd), jnp.bfloat16),   # V cache
                                pltpu.VMEM((TQ, D), jnp.bfloat16)]),         # head concat
            compiler_params=pltpu.CompilerParams(
                dimension_semantics=("parallel", "arbitrary"),
                vmem_limit_bytes=vmem_limit(single_buf)),
        )

    args = (x, x, add_mask) + weights
    try:
        # grid-invariant weights + full-seq x: single buffering halves their residency
        return build(True)(*args)
    except _SINGLE_BUFFER_FALLBACK_ERRORS:
        # fall back to default double-buffered specs only if the single-buffered
        # build is unsupported / fails to compile; other errors propagate.
        return build(False)(*args)


def init_params(key, d_model, n_head, intermediate):
    D, I = d_model, intermediate
    ks = jax.random.split(key, 4)

    def kaiming_uniform(k, shape, fan_in):          # torch kaiming_uniform_(relu)
        bound = (2.0 ** 0.5) * (3.0 / fan_in) ** 0.5
        return jax.random.uniform(k, shape, jnp.float32, -bound, bound)

    def xavier_uniform(k, shape):                   # torch xavier_uniform_
        fan_out, fan_in = shape
        bound = (6.0 / (fan_in + fan_out)) ** 0.5
        return jax.random.uniform(k, shape, jnp.float32, -bound, bound)

    in_proj_w = xavier_uniform(ks[0], (3 * D, D))   # nn.MultiheadAttention in_proj
    out_proj_w = kaiming_uniform(ks[1], (D, D), D)  # out_proj linear
    l1_w = kaiming_uniform(ks[2], (I, D), D)        # module _reset_weights
    l2_w = kaiming_uniform(ks[3], (D, I), I)

    return {
        "ln1_g": jnp.ones((1, D), jnp.float32),
        "ln1_b": jnp.zeros((1, D), jnp.float32),
        "w_qkv": in_proj_w.T,                       # (D, 3D), biases zero as in torch
        "b_qkv": jnp.zeros((1, 3 * D), jnp.float32),
        "w_o": out_proj_w.T,                        # (D, D)
        "b_o": jnp.zeros((1, D), jnp.float32),
        "ln2_g": jnp.ones((1, D), jnp.float32),
        "ln2_b": jnp.zeros((1, D), jnp.float32),
        "w1": l1_w.T,                               # (D, I)
        "b1": jnp.zeros((1, I), jnp.float32),
        "w2": l2_w.T,                               # (I, D)
        "b2": jnp.zeros((1, D), jnp.float32),
    }


def reference(x, inp_len, params, n_head):
    # pure-JAX f32 mirror of the PyTorch forward (eval mode) for correctness check
    B, S, D = x.shape
    hd = D // n_head
    pos = jnp.arange(S)[None, :]
    mask = jnp.where(pos >= inp_len[:, None], -1e30, 0.0)[:, None, None, :]

    def ln(y, g, b):
        mu = y.mean(-1, keepdims=True)
        var = ((y - mu) ** 2).mean(-1, keepdims=True)
        return (y - mu) / jnp.sqrt(var + 1e-5) * g + b

    xn = ln(x, params["ln1_g"][0], params["ln1_b"][0])
    qkv = xn @ params["w_qkv"] + params["b_qkv"][0]
    q, k, v = qkv[..., :D], qkv[..., D:2 * D], qkv[..., 2 * D:]
    q = q.reshape(B, S, n_head, hd).transpose(0, 2, 1, 3) / hd ** 0.5
    k = k.reshape(B, S, n_head, hd).transpose(0, 2, 1, 3)
    v = v.reshape(B, S, n_head, hd).transpose(0, 2, 1, 3)
    s = jnp.einsum("bhqd,bhkd->bhqk", q, k) + mask
    p = jax.nn.softmax(s, axis=-1)
    a = jnp.einsum("bhqk,bhkd->bhqd", p, v).transpose(0, 2, 1, 3).reshape(B, S, D)
    a = a @ params["w_o"] + params["b_o"][0]
    x = x + a
    xn2 = ln(x, params["ln2_g"][0], params["ln2_b"][0])
    h = jnp.maximum(xn2 @ params["w1"] + params["b1"][0], 0.0)
    return x + h @ params["w2"] + params["b2"][0]


if __name__ == "__main__":
    B, S, D, H, I = 2, 8, 32, 4, 64
    key = jax.random.PRNGKey(0)
    kx, kp = jax.random.split(key)
    x = jax.random.normal(kx, (B, S, D), jnp.float32)
    inp_len = jnp.array([8, 5], jnp.int32)   # sequence lengths (rest is padding)
    params = init_params(kp, D, H, I)

    out = preln_encoder(x, inp_len, params, H)
    out = jax.block_until_ready(out)

    ref = reference(x, inp_len, params, H)
    err = float(jnp.max(jnp.abs(out - ref)))
    assert out.shape == (B, S, D)
    # tolerance reflects bf16 MXU operands + approx softmax reciprocal (intentional,
    # inference-grade); accumulation, LayerNorm stats and softmax stats stay f32.
    assert jnp.allclose(out, ref, atol=5e-2, rtol=5e-2), err
    print("KERNEL_OK")
</pallas_src>

<mosaic_0001>
module attributes {stable_mosaic.version = 11 : i64} {
  func.func @encoder_kernel(%arg0: i32, %arg1: i32, %arg2: memref<1x8x32xf32, #tpu.memory_space<vmem>>, %arg3: memref<1x8x32xf32, #tpu.memory_space<vmem>>, %arg4: memref<1x1x8xf32, #tpu.memory_space<vmem>>, %arg5: memref<1x32xf32, #tpu.memory_space<vmem>>, %arg6: memref<1x32xf32, #tpu.memory_space<vmem>>, %arg7: memref<32x32xbf16, #tpu.memory_space<vmem>>, %arg8: memref<1x32xf32, #tpu.memory_space<vmem>>, %arg9: memref<32x64xbf16, #tpu.memory_space<vmem>>, %arg10: memref<1x64xf32, #tpu.memory_space<vmem>>, %arg11: memref<32x32xbf16, #tpu.memory_space<vmem>>, %arg12: memref<1x32xf32, #tpu.memory_space<vmem>>, %arg13: memref<1x32xf32, #tpu.memory_space<vmem>>, %arg14: memref<1x32xf32, #tpu.memory_space<vmem>>, %arg15: memref<1x32x64xbf16, #tpu.memory_space<vmem>>, %arg16: memref<1x1x64xf32, #tpu.memory_space<vmem>>, %arg17: memref<1x64x32xbf16, #tpu.memory_space<vmem>>, %arg18: memref<1x32xf32, #tpu.memory_space<vmem>>, %arg19: memref<1x8x32xf32, #tpu.memory_space<vmem>>, %arg20: memref<4x8x8xbf16, #tpu.memory_space<vmem>>, %arg21: memref<4x8x8xbf16, #tpu.memory_space<vmem>>, %arg22: memref<8x32xbf16, #tpu.memory_space<vmem>>) attributes {dimension_semantics = [#tpu.dimension_semantics<parallel>, #tpu.dimension_semantics<arbitrary>], iteration_bounds = array<i64: 2, 1>, scalar_prefetch = 0 : i64, scratch_operands = 3 : i64, tpu.core_type = #tpu.core_type<tc>, window_params = [{transform_indices = @transform_0, window_bounds = array<i64: 1, 8, 32>}, {pipeline_mode = #tpu.pipeline_mode<synchronous>, transform_indices = @transform_1, window_bounds = array<i64: 1, 8, 32>}, {transform_indices = @transform_2, window_bounds = array<i64: 1, 1, 8>}, {pipeline_mode = #tpu.pipeline_mode<synchronous>, transform_indices = @transform_3, window_bounds = array<i64: 1, 32>}, {pipeline_mode = #tpu.pipeline_mode<synchronous>, transform_indices = @transform_4, window_bounds = array<i64: 1, 32>}, {pipeline_mode = #tpu.pipeline_mode<synchronous>, transform_indices = @transform_5, window_bounds = array<i64: 32, 32>}, {pipeline_mode = #tpu.pipeline_mode<synchronous>, transform_indices = @transform_6, window_bounds = array<i64: 1, 32>}, {pipeline_mode = #tpu.pipeline_mode<synchronous>, transform_indices = @transform_7, window_bounds = array<i64: 32, 64>}, {pipeline_mode = #tpu.pipeline_mode<synchronous>, transform_indices = @transform_8, window_bounds = array<i64: 1, 64>}, {pipeline_mode = #tpu.pipeline_mode<synchronous>, transform_indices = @transform_9, window_bounds = array<i64: 32, 32>}, {pipeline_mode = #tpu.pipeline_mode<synchronous>, transform_indices = @transform_10, window_bounds = array<i64: 1, 32>}, {pipeline_mode = #tpu.pipeline_mode<synchronous>, transform_indices = @transform_11, window_bounds = array<i64: 1, 32>}, {pipeline_mode = #tpu.pipeline_mode<synchronous>, transform_indices = @transform_12, window_bounds = array<i64: 1, 32>}, {pipeline_mode = #tpu.pipeline_mode<synchronous>, transform_indices = @transform_13, window_bounds = array<i64: 1, 32, 64>}, {pipeline_mode = #tpu.pipeline_mode<synchronous>, transform_indices = @transform_14, window_bounds = array<i64: 1, 1, 64>}, {pipeline_mode = #tpu.pipeline_mode<synchronous>, transform_indices = @transform_15, window_bounds = array<i64: 1, 64, 32>}, {pipeline_mode = #tpu.pipeline_mode<synchronous>, transform_indices = @transform_16, window_bounds = array<i64: 1, 32>}, {transform_indices = @transform_17, window_bounds = array<i64: 1, 8, 32>}]} {
    %c0_i32 = arith.constant 0 : i32
    %0 = arith.cmpi eq, %arg1, %c0_i32 : i32
    %1 = arith.extui %0 : i1 to i32
    %c0_i32_0 = arith.constant 0 : i32
    %2 = arith.cmpi ne, %1, %c0_i32_0 : i32
    scf.if %2 {
      %c0_94 = arith.constant 0 : index
      %c0_95 = arith.constant 0 : index
      %c0_96 = arith.constant 0 : index
      %185 = vector.load %arg3[%c0_94, %c0_95, %c0_96] : memref<1x8x32xf32, #tpu.memory_space<vmem>>, vector<1x8x32xf32>
      %186 = vector.shape_cast %185 : vector<1x8x32xf32> to vector<8x32xf32>
      %c0_97 = arith.constant 0 : index
      %c0_98 = arith.constant 0 : index
      %187 = vector.load %arg5[%c0_97, %c0_98] : memref<1x32xf32, #tpu.memory_space<vmem>>, vector<1x32xf32>
      %c0_99 = arith.constant 0 : index
      %c0_100 = arith.constant 0 : index
      %188 = vector.load %arg6[%c0_99, %c0_100] : memref<1x32xf32, #tpu.memory_space<vmem>>, vector<1x32xf32>
      %cst_101 = arith.constant dense<0.000000e+00> : vector<8xf32>
      %189 = vector.multi_reduction <add>, %186, %cst_101 [1] : vector<8x32xf32> to vector<8xf32>
      %190 = vector.shape_cast %189 : vector<8xf32> to vector<8x1xf32>
      %cst_102 = arith.constant 3.200000e+01 : f32
      %191 = vector.broadcast %cst_102 : f32 to vector<8x1xf32>
      %192 = arith.divf %190, %191 : vector<8x1xf32>
      %193 = vector.broadcast %192 : vector<8x1xf32> to vector<8x32xf32>
      %194 = arith.subf %186, %193 : vector<8x32xf32>
      %195 = arith.mulf %194, %194 : vector<8x32xf32>
      %cst_103 = arith.constant dense<0.000000e+00> : vector<8xf32>
      %196 = vector.multi_reduction <add>, %195, %cst_103 [1] : vector<8x32xf32> to vector<8xf32>
      %197 = vector.shape_cast %196 : vector<8xf32> to vector<8x1xf32>
      %cst_104 = arith.constant 3.200000e+01 : f32
      %198 = vector.broadcast %cst_104 : f32 to vector<8x1xf32>
      %199 = arith.divf %197, %198 : vector<8x1xf32>
      %200 = vector.broadcast %192 : vector<8x1xf32> to vector<8x32xf32>
      %201 = arith.subf %186, %200 : vector<8x32xf32>
      %cst_105 = arith.constant 9.99999974E-6 : f32
      %202 = vector.broadcast %cst_105 : f32 to vector<8x1xf32>
      %203 = arith.addf %199, %202 : vector<8x1xf32>
      %204 = math.rsqrt %203 : vector<8x1xf32>
      %205 = vector.broadcast %204 : vector<8x1xf32> to vector<8x32xf32>
      %206 = arith.mulf %201, %205 : vector<8x32xf32>
      %207 = vector.broadcast %187 : vector<1x32xf32> to vector<8x32xf32>
      %208 = arith.mulf %206, %207 : vector<8x32xf32>
      %209 = vector.broadcast %188 : vector<1x32xf32> to vector<8x32xf32>
      %210 = arith.addf %208, %209 : vector<8x32xf32>
      %211 = arith.truncf %210 : vector<8x32xf32> to vector<8x32xbf16>
      %c0_106 = arith.constant 0 : index
      %c0_107 = arith.constant 0 : index
      %212 = vector.load %arg9[%c0_106, %c0_107] : memref<32x64xbf16, #tpu.memory_space<vmem>>, vector<32x64xbf16>
      %cst_108 = arith.constant dense<0.000000e+00> : vector<8x64xf32>
      %213 = tpu.matmul %211, %212, %cst_108 {dimension_numbers = #tpu.dot_dimension_numbers<[1], [0], [0], [1], [0, 0, 1, 1], [], []>} : vector<8x32xbf16>, vector<32x64xbf16>, vector<8x64xf32> -> vector<8x64xf32>
      %c0_109 = arith.constant 0 : index
      %c0_110 = arith.constant 0 : index
      %214 = vector.load %arg10[%c0_109, %c0_110] : memref<1x64xf32, #tpu.memory_space<vmem>>, vector<1x64xf32>
      %215 = vector.broadcast %214 : vector<1x64xf32> to vector<8x64xf32>
      %216 = arith.addf %213, %215 : vector<8x64xf32>
      %217 = vector.extract_strided_slice %216 {offsets = [0, 0], sizes = [8, 8], strides = [1, 1]} : vector<8x64xf32> to vector<8x8xf32>
      %218 = arith.truncf %217 : vector<8x8xf32> to vector<8x8xbf16>
      %c0_111 = arith.constant 0 : index
      %c0_112 = arith.constant 0 : index
      %c0_113 = arith.constant 0 : index
      %219 = vector.load %arg20[%c0_111, %c0_112, %c0_113] : memref<4x8x8xbf16, #tpu.memory_space<vmem>>, vector<1x8x8xbf16>
      %220 = vector.shape_cast %219 : vector<1x8x8xbf16> to vector<8x8xbf16>
      %221 = vector.shape_cast %218 : vector<8x8xbf16> to vector<1x8x8xbf16>
      tpu.vector_store %arg20[%c0_111, %c0_112, %c0_113], %221 {strides = array<i32>} : memref<4x8x8xbf16, #tpu.memory_space<vmem>>, vector<1x8x8xbf16>,
      %222 = vector.extract_strided_slice %216 {offsets = [0, 32], sizes = [8, 8], strides = [1, 1]} : vector<8x64xf32> to vector<8x8xf32>
      %223 = arith.truncf %222 : vector<8x8xf32> to vector<8x8xbf16>
      %c0_114 = arith.constant 0 : index
      %c0_115 = arith.constant 0 : index
      %c0_116 = arith.constant 0 : index
      %224 = vector.load %arg21[%c0_114, %c0_115, %c0_116] : memref<4x8x8xbf16, #tpu.memory_space<vmem>>, vector<1x8x8xbf16>
      %225 = vector.shape_cast %224 : vector<1x8x8xbf16> to vector<8x8xbf16>
      %226 = vector.shape_cast %223 : vector<8x8xbf16> to vector<1x8x8xbf16>
      tpu.vector_store %arg21[%c0_114, %c0_115, %c0_116], %226 {strides = array<i32>} : memref<4x8x8xbf16, #tpu.memory_space<vmem>>, vector<1x8x8xbf16>,
      %227 = vector.extract_strided_slice %216 {offsets = [0, 8], sizes = [8, 8], strides = [1, 1]} : vector<8x64xf32> to vector<8x8xf32>
      %228 = arith.truncf %227 : vector<8x8xf32> to vector<8x8xbf16>
      %c1_117 = arith.constant 1 : index
      %c0_118 = arith.constant 0 : index
      %c0_119 = arith.constant 0 : index
      %229 = vector.load %arg20[%c1_117, %c0_118, %c0_119] : memref<4x8x8xbf16, #tpu.memory_space<vmem>>, vector<1x8x8xbf16>
      %230 = vector.shape_cast %229 : vector<1x8x8xbf16> to vector<8x8xbf16>
      %231 = vector.shape_cast %228 : vector<8x8xbf16> to vector<1x8x8xbf16>
      tpu.vector_store %arg20[%c1_117, %c0_118, %c0_119], %231 {strides = array<i32>} : memref<4x8x8xbf16, #tpu.memory_space<vmem>>, vector<1x8x8xbf16>,
      %232 = vector.extract_strided_slice %216 {offsets = [0, 40], sizes = [8, 8], strides = [1, 1]} : vector<8x64xf32> to vector<8x8xf32>
      %233 = arith.truncf %232 : vector<8x8xf32> to vector<8x8xbf16>
      %c1_120 = arith.constant 1 : index
      %c0_121 = arith.constant 0 : index
      %c0_122 = arith.constant 0 : index
      %234 = vector.load %arg21[%c1_120, %c0_121, %c0_122] : memref<4x8x8xbf16, #tpu.memory_space<vmem>>, vector<1x8x8xbf16>
      %235 = vector.shape_cast %234 : vector<1x8x8xbf16> to vector<8x8xbf16>
      %236 = vector.shape_cast %233 : vector<8x8xbf16> to vector<1x8x8xbf16>
      tpu.vector_store %arg21[%c1_120, %c0_121, %c0_122], %236 {strides = array<i32>} : memref<4x8x8xbf16, #tpu.memory_space<vmem>>, vector<1x8x8xbf16>,
      %237 = vector.extract_strided_slice %216 {offsets = [0, 16], sizes = [8, 8], strides = [1, 1]} : vector<8x64xf32> to vector<8x8xf32>
      %238 = arith.truncf %237 : vector<8x8xf32> to vector<8x8xbf16>
      %c2_123 = arith.constant 2 : index
      %c0_124 = arith.constant 0 : index
      %c0_125 = arith.constant 0 : index
      %239 = vector.load %arg20[%c2_123, %c0_124, %c0_125] : memref<4x8x8xbf16, #tpu.memory_space<vmem>>, vector<1x8x8xbf16>
      %240 = vector.shape_cast %239 : vector<1x8x8xbf16> to vector<8x8xbf16>
      %241 = vector.shape_cast %238 : vector<8x8xbf16> to vector<1x8x8xbf16>
      tpu.vector_store %arg20[%c2_123, %c0_124, %c0_125], %241 {strides = array<i32>} : memref<4x8x8xbf16, #tpu.memory_space<vmem>>, vector<1x8x8xbf16>,
      %242 = vector.extract_strided_slice %216 {offsets = [0, 48], sizes = [8, 8], strides = [1, 1]} : vector<8x64xf32> to vector<8x8xf32>
      %243 = arith.truncf %242 : vector<8x8xf32> to vector<8x8xbf16>
      %c2_126 = arith.constant 2 : index
      %c0_127 = arith.constant 0 : index
      %c0_128 = arith.constant 0 : index
      %244 = vector.load %arg21[%c2_126, %c0_127, %c0_128] : memref<4x8x8xbf16, #tpu.memory_space<vmem>>, vector<1x8x8xbf16>
      %245 = vector.shape_cast %244 : vector<1x8x8xbf16> to vector<8x8xbf16>
      %246 = vector.shape_cast %243 : vector<8x8xbf16> to vector<1x8x8xbf16>
      tpu.vector_store %arg21[%c2_126, %c0_127, %c0_128], %246 {strides = array<i32>} : memref<4x8x8xbf16, #tpu.memory_space<vmem>>, vector<1x8x8xbf16>,
      %247 = vector.extract_strided_slice %216 {offsets = [0, 24], sizes = [8, 8], strides = [1, 1]} : vector<8x64xf32> to vector<8x8xf32>
      %248 = arith.truncf %247 : vector<8x8xf32> to vector<8x8xbf16>
      %c3_129 = arith.constant 3 : index
      %c0_130 = arith.constant 0 : index
      %c0_131 = arith.constant 0 : index
      %249 = vector.load %arg20[%c3_129, %c0_130, %c0_131] : memref<4x8x8xbf16, #tpu.memory_space<vmem>>, vector<1x8x8xbf16>
      %250 = vector.shape_cast %249 : vector<1x8x8xbf16> to vector<8x8xbf16>
      %251 = vector.shape_cast %248 : vector<8x8xbf16> to vector<1x8x8xbf16>
      tpu.vector_store %arg20[%c3_129, %c0_130, %c0_131], %251 {strides = array<i32>} : memref<4x8x8xbf16, #tpu.memory_space<vmem>>, vector<1x8x8xbf16>,
      %252 = vector.extract_strided_slice %216 {offsets = [0, 56], sizes = [8, 8], strides = [1, 1]} : vector<8x64xf32> to vector<8x8xf32>
      %253 = arith.truncf %252 : vector<8x8xf32> to vector<8x8xbf16>
      %c3_132 = arith.constant 3 : index
      %c0_133 = arith.constant 0 : index
      %c0_134 = arith.constant 0 : index
      %254 = vector.load %arg21[%c3_132, %c0_133, %c0_134] : memref<4x8x8xbf16, #tpu.memory_space<vmem>>, vector<1x8x8xbf16>
      %255 = vector.shape_cast %254 : vector<1x8x8xbf16> to vector<8x8xbf16>
      %256 = vector.shape_cast %253 : vector<8x8xbf16> to vector<1x8x8xbf16>
      tpu.vector_store %arg21[%c3_132, %c0_133, %c0_134], %256 {strides = array<i32>} : memref<4x8x8xbf16, #tpu.memory_space<vmem>>, vector<1x8x8xbf16>,
    } else {
    }
    %c0 = arith.constant 0 : index
    %c0_1 = arith.constant 0 : index
    %c0_2 = arith.constant 0 : index
    %3 = vector.load %arg2[%c0, %c0_1, %c0_2] : memref<1x8x32xf32, #tpu.memory_space<vmem>>, vector<1x8x32xf32>
    %4 = vector.shape_cast %3 : vector<1x8x32xf32> to vector<8x32xf32>
    %c0_3 = arith.constant 0 : index
    %c0_4 = arith.constant 0 : index
    %5 = vector.load %arg5[%c0_3, %c0_4] : memref<1x32xf32, #tpu.memory_space<vmem>>, vector<1x32xf32>
    %c0_5 = arith.constant 0 : index
    %c0_6 = arith.constant 0 : index
    %6 = vector.load %arg6[%c0_5, %c0_6] : memref<1x32xf32, #tpu.memory_space<vmem>>, vector<1x32xf32>
    %cst = arith.constant dense<0.000000e+00> : vector<8xf32>
    %7 = vector.multi_reduction <add>, %4, %cst [1] : vector<8x32xf32> to vector<8xf32>
    %8 = vector.shape_cast %7 : vector<8xf32> to vector<8x1xf32>
    %cst_7 = arith.constant 3.200000e+01 : f32
    %9 = vector.broadcast %cst_7 : f32 to vector<8x1xf32>
    %10 = arith.divf %8, %9 : vector<8x1xf32>
    %11 = vector.broadcast %10 : vector<8x1xf32> to vector<8x32xf32>
    %12 = arith.subf %4, %11 : vector<8x32xf32>
    %13 = arith.mulf %12, %12 : vector<8x32xf32>
    %cst_8 = arith.constant dense<0.000000e+00> : vector<8xf32>
    %14 = vector.multi_reduction <add>, %13, %cst_8 [1] : vector<8x32xf32> to vector<8xf32>
    %15 = vector.shape_cast %14 : vector<8xf32> to vector<8x1xf32>
    %cst_9 = arith.constant 3.200000e+01 : f32
    %16 = vector.broadcast %cst_9 : f32 to vector<8x1xf32>
    %17 = arith.divf %15, %16 : vector<8x1xf32>
    %18 = vector.broadcast %10 : vector<8x1xf32> to vector<8x32xf32>
    %19 = arith.subf %4, %18 : vector<8x32xf32>
    %cst_10 = arith.constant 9.99999974E-6 : f32
    %20 = vector.broadcast %cst_10 : f32 to vector<8x1xf32>
    %21 = arith.addf %17, %20 : vector<8x1xf32>
    %22 = math.rsqrt %21 : vector<8x1xf32>
    %23 = vector.broadcast %22 : vector<8x1xf32> to vector<8x32xf32>
    %24 = arith.mulf %19, %23 : vector<8x32xf32>
    %25 = vector.broadcast %5 : vector<1x32xf32> to vector<8x32xf32>
    %26 = arith.mulf %24, %25 : vector<8x32xf32>
    %27 = vector.broadcast %6 : vector<1x32xf32> to vector<8x32xf32>
    %28 = arith.addf %26, %27 : vector<8x32xf32>
    %29 = arith.truncf %28 : vector<8x32xf32> to vector<8x32xbf16>
    %c0_11 = arith.constant 0 : index
    %c0_12 = arith.constant 0 : index
    %30 = vector.load %arg7[%c0_11, %c0_12] : memref<32x32xbf16, #tpu.memory_space<vmem>>, vector<32x32xbf16>
    %cst_13 = arith.constant dense<0.000000e+00> : vector<8x32xf32>
    %31 = tpu.matmul %29, %30, %cst_13 {dimension_numbers = #tpu.dot_dimension_numbers<[1], [0], [0], [1], [0, 0, 1, 1], [], []>} : vector<8x32xbf16>, vector<32x32xbf16>, vector<8x32xf32> -> vector<8x32xf32>
    %c0_14 = arith.constant 0 : index
    %c0_15 = arith.constant 0 : index
    %32 = vector.load %arg8[%c0_14, %c0_15] : memref<1x32xf32, #tpu.memory_space<vmem>>, vector<1x32xf32>
    %33 = vector.broadcast %32 : vector<1x32xf32> to vector<8x32xf32>
    %34 = arith.addf %31, %33 : vector<8x32xf32>
    %cst_16 = arith.constant 0.353553385 : f32
    %35 = vector.broadcast %cst_16 : f32 to vector<8x32xf32>
    %36 = arith.mulf %34, %35 : vector<8x32xf32>
    %37 = arith.truncf %36 : vector<8x32xf32> to vector<8x32xbf16>
    %c0_17 = arith.constant 0 : index
    %c0_18 = arith.constant 0 : index
    %c0_19 = arith.constant 0 : index
    %38 = vector.load %arg4[%c0_17, %c0_18, %c0_19] : memref<1x1x8xf32, #tpu.memory_space<vmem>>, vector<1x1x8xf32>
    %39 = vector.shape_cast %38 : vector<1x1x8xf32> to vector<1x8xf32>
    %40 = vector.extract_strided_slice %37 {offsets = [0, 0], sizes = [8, 8], strides = [1, 1]} : vector<8x32xbf16> to vector<8x8xbf16>
    %c0_20 = arith.constant 0 : index
    %c0_21 = arith.constant 0 : index
    %c0_22 = arith.constant 0 : index
    %41 = vector.load %arg20[%c0_20, %c0_21, %c0_22] : memref<4x8x8xbf16, #tpu.memory_space<vmem>>, vector<1x8x8xbf16>
    %42 = vector.shape_cast %41 : vector<1x8x8xbf16> to vector<8x8xbf16>
    %cst_23 = arith.constant dense<0.000000e+00> : vector<8x8xf32>
    %43 = tpu.matmul %40, %42, %cst_23 {dimension_numbers = #tpu.dot_dimension_numbers<[1], [1], [0], [0], [0, 0, 1, 0], [], []>} : vector<8x8xbf16>, vector<8x8xbf16>, vector<8x8xf32> -> vector<8x8xf32>
    %44 = vector.broadcast %39 : vector<1x8xf32> to vector<8x8xf32>
    %45 = arith.addf %43, %44 : vector<8x8xf32>
    %cst_24 = arith.constant dense<0xFF800000> : vector<8xf32>
    %46 = vector.multi_reduction <maximumf>, %45, %cst_24 [1] : vector<8x8xf32> to vector<8xf32>
    %47 = vector.shape_cast %46 : vector<8xf32> to vector<8x1xf32>
    %48 = vector.broadcast %47 : vector<8x1xf32> to vector<8x8xf32>
    %49 = arith.subf %45, %48 : vector<8x8xf32>
    %50 = math.exp %49 : vector<8x8xf32>
    %cst_25 = arith.constant dense<0.000000e+00> : vector<8xf32>
    %51 = vector.multi_reduction <add>, %50, %cst_25 [1] : vector<8x8xf32> to vector<8xf32>
    %52 = vector.shape_cast %51 : vector<8xf32> to vector<8x1xf32>
    %53 = tpu.reciprocal %52 {approx = true} : vector<8x1xf32> -> vector<8x1xf32>
    %54 = vector.broadcast %53 : vector<8x1xf32> to vector<8x8xf32>
    %55 = arith.mulf %50, %54 : vector<8x8xf32>
    %56 = arith.truncf %55 : vector<8x8xf32> to vector<8x8xbf16>
    %c0_26 = arith.constant 0 : index
    %c0_27 = arith.constant 0 : index
    %c0_28 = arith.constant 0 : index
    %57 = vector.load %arg21[%c0_26, %c0_27, %c0_28] : memref<4x8x8xbf16, #tpu.memory_space<vmem>>, vector<1x8x8xbf16>
    %58 = vector.shape_cast %57 : vector<1x8x8xbf16> to vector<8x8xbf16>
    %cst_29 = arith.constant dense<0.000000e+00> : vector<8x8xf32>
    %59 = tpu.matmul %56, %58, %cst_29 {dimension_numbers = #tpu.dot_dimension_numbers<[1], [0], [0], [1], [0, 0, 1, 1], [], []>} : vector<8x8xbf16>, vector<8x8xbf16>, vector<8x8xf32> -> vector<8x8xf32>
    %60 = arith.truncf %59 : vector<8x8xf32> to vector<8x8xbf16>
    %c0_30 = arith.constant 0 : index
    %c0_31 = arith.constant 0 : index
    %61 = vector.load %arg22[%c0_30, %c0_31] : memref<8x32xbf16, #tpu.memory_space<vmem>>, vector<8x8xbf16>
    tpu.vector_store %arg22[%c0_30, %c0_31], %60 {strides = array<i32>} : memref<8x32xbf16, #tpu.memory_space<vmem>>, vector<8x8xbf16>,
    %62 = vector.extract_strided_slice %37 {offsets = [0, 8], sizes = [8, 8], strides = [1, 1]} : vector<8x32xbf16> to vector<8x8xbf16>
    %c1 = arith.constant 1 : index
    %c0_32 = arith.constant 0 : index
    %c0_33 = arith.constant 0 : index
    %63 = vector.load %arg20[%c1, %c0_32, %c0_33] : memref<4x8x8xbf16, #tpu.memory_space<vmem>>, vector<1x8x8xbf16>
    %64 = vector.shape_cast %63 : vector<1x8x8xbf16> to vector<8x8xbf16>
    %cst_34 = arith.constant dense<0.000000e+00> : vector<8x8xf32>
    %65 = tpu.matmul %62, %64, %cst_34 {dimension_numbers = #tpu.dot_dimension_numbers<[1], [1], [0], [0], [0, 0, 1, 0], [], []>} : vector<8x8xbf16>, vector<8x8xbf16>, vector<8x8xf32> -> vector<8x8xf32>
    %66 = vector.broadcast %39 : vector<1x8xf32> to vector<8x8xf32>
    %67 = arith.addf %65, %66 : vector<8x8xf32>
    %cst_35 = arith.constant dense<0xFF800000> : vector<8xf32>
    %68 = vector.multi_reduction <maximumf>, %67, %cst_35 [1] : vector<8x8xf32> to vector<8xf32>
    %69 = vector.shape_cast %68 : vector<8xf32> to vector<8x1xf32>
    %70 = vector.broadcast %69 : vector<8x1xf32> to vector<8x8xf32>
    %71 = arith.subf %67, %70 : vector<8x8xf32>
    %72 = math.exp %71 : vector<8x8xf32>
    %cst_36 = arith.constant dense<0.000000e+00> : vector<8xf32>
    %73 = vector.multi_reduction <add>, %72, %cst_36 [1] : vector<8x8xf32> to vector<8xf32>
    %74 = vector.shape_cast %73 : vector<8xf32> to vector<8x1xf32>
    %75 = tpu.reciprocal %74 {approx = true} : vector<8x1xf32> -> vector<8x1xf32>
    %76 = vector.broadcast %75 : vector<8x1xf32> to vector<8x8xf32>
    %77 = arith.mulf %72, %76 : vector<8x8xf32>
    %78 = arith.truncf %77 : vector<8x8xf32> to vector<8x8xbf16>
    %c1_37 = arith.constant 1 : index
    %c0_38 = arith.constant 0 : index
    %c0_39 = arith.constant 0 : index
    %79 = vector.load %arg21[%c1_37, %c0_38, %c0_39] : memref<4x8x8xbf16, #tpu.memory_space<vmem>>, vector<1x8x8xbf16>
    %80 = vector.shape_cast %79 : vector<1x8x8xbf16> to vector<8x8xbf16>
    %cst_40 = arith.constant dense<0.000000e+00> : vector<8x8xf32>
    %81 = tpu.matmul %78, %80, %cst_40 {dimension_numbers = #tpu.dot_dimension_numbers<[1], [0], [0], [1], [0, 0, 1, 1], [], []>} : vector<8x8xbf16>, vector<8x8xbf16>, vector<8x8xf32> -> vector<8x8xf32>
    %82 = arith.truncf %81 : vector<8x8xf32> to vector<8x8xbf16>
    %c0_41 = arith.constant 0 : index
    %c8 = arith.constant 8 : index
    %83 = vector.load %arg22[%c0_41, %c8] : memref<8x32xbf16, #tpu.memory_space<vmem>>, vector<8x8xbf16>
    tpu.vector_store %arg22[%c0_41, %c8], %82 {strides = array<i32>} : memref<8x32xbf16, #tpu.memory_space<vmem>>, vector<8x8xbf16>,
    %84 = vector.extract_strided_slice %37 {offsets = [0, 16], sizes = [8, 8], strides = [1, 1]} : vector<8x32xbf16> to vector<8x8xbf16>
    %c2 = arith.constant 2 : index
    %c0_42 = arith.constant 0 : index
    %c0_43 = arith.constant 0 : index
    %85 = vector.load %arg20[%c2, %c0_42, %c0_43] : memref<4x8x8xbf16, #tpu.memory_space<vmem>>, vector<1x8x8xbf16>
    %86 = vector.shape_cast %85 : vector<1x8x8xbf16> to vector<8x8xbf16>
    %cst_44 = arith.constant dense<0.000000e+00> : vector<8x8xf32>
    %87 = tpu.matmul %84, %86, %cst_44 {dimension_numbers = #tpu.dot_dimension_numbers<[1], [1], [0], [0], [0, 0, 1, 0], [], []>} : vector<8x8xbf16>, vector<8x8xbf16>, vector<8x8xf32> -> vector<8x8xf32>
    %88 = vector.broadcast %39 : vector<1x8xf32> to vector<8x8xf32>
    %89 = arith.addf %87, %88 : vector<8x8xf32>
    %cst_45 = arith.constant dense<0xFF800000> : vector<8xf32>
    %90 = vector.multi_reduction <maximumf>, %89, %cst_45 [1] : vector<8x8xf32> to vector<8xf32>
    %91 = vector.shape_cast %90 : vector<8xf32> to vector<8x1xf32>
    %92 = vector.broadcast %91 : vector<8x1xf32> to vector<8x8xf32>
    %93 = arith.subf %89, %92 : vector<8x8xf32>
    %94 = math.exp %93 : vector<8x8xf32>
    %cst_46 = arith.constant dense<0.000000e+00> : vector<8xf32>
    %95 = vector.multi_reduction <add>, %94, %cst_46 [1] : vector<8x8xf32> to vector<8xf32>
    %96 = vector.shape_cast %95 : vector<8xf32> to vector<8x1xf32>
    %97 = tpu.reciprocal %96 {approx = true} : vector<8x1xf32> -> vector<8x1xf32>
    %98 = vector.broadcast %97 : vector<8x1xf32> to vector<8x8xf32>
    %99 = arith.mulf %94, %98 : vector<8x8xf32>
    %100 = arith.truncf %99 : vector<8x8xf32> to vector<8x8xbf16>
    %c2_47 = arith.constant 2 : index
    %c0_48 = arith.constant 0 : index
    %c0_49 = arith.constant 0 : index
    %101 = vector.load %arg21[%c2_47, %c0_48, %c0_49] : memref<4x8x8xbf16, #tpu.memory_space<vmem>>, vector<1x8x8xbf16>
    %102 = vector.shape_cast %101 : vector<1x8x8xbf16> to vector<8x8xbf16>
    %cst_50 = arith.constant dense<0.000000e+00> : vector<8x8xf32>
    %103 = tpu.matmul %100, %102, %cst_50 {dimension_numbers = #tpu.dot_dimension_numbers<[1], [0], [0], [1], [0, 0, 1, 1], [], []>} : vector<8x8xbf16>, vector<8x8xbf16>, vector<8x8xf32> -> vector<8x8xf32>
    %104 = arith.truncf %103 : vector<8x8xf32> to vector<8x8xbf16>
    %c0_51 = arith.constant 0 : index
    %c16 = arith.constant 16 : index
    %105 = vector.load %arg22[%c0_51, %c16] : memref<8x32xbf16, #tpu.memory_space<vmem>>, vector<8x8xbf16>
    tpu.vector_store %arg22[%c0_51, %c16], %104 {strides = array<i32>} : memref<8x32xbf16, #tpu.memory_space<vmem>>, vector<8x8xbf16>,
    %106 = vector.extract_strided_slice %37 {offsets = [0, 24], sizes = [8, 8], strides = [1, 1]} : vector<8x32xbf16> to vector<8x8xbf16>
    %c3 = arith.constant 3 : index
    %c0_52 = arith.constant 0 : index
    %c0_53 = arith.constant 0 : index
    %107 = vector.load %arg20[%c3, %c0_52, %c0_53] : memref<4x8x8xbf16, #tpu.memory_space<vmem>>, vector<1x8x8xbf16>
    %108 = vector.shape_cast %107 : vector<1x8x8xbf16> to vector<8x8xbf16>
    %cst_54 = arith.constant dense<0.000000e+00> : vector<8x8xf32>
    %109 = tpu.matmul %106, %108, %cst_54 {dimension_numbers = #tpu.dot_dimension_numbers<[1], [1], [0], [0], [0, 0, 1, 0], [], []>} : vector<8x8xbf16>, vector<8x8xbf16>, vector<8x8xf32> -> vector<8x8xf32>
    %110 = vector.broadcast %39 : vector<1x8xf32> to vector<8x8xf32>
    %111 = arith.addf %109, %110 : vector<8x8xf32>
    %cst_55 = arith.constant dense<0xFF800000> : vector<8xf32>
    %112 = vector.multi_reduction <maximumf>, %111, %cst_55 [1] : vector<8x8xf32> to vector<8xf32>
    %113 = vector.shape_cast %112 : vector<8xf32> to vector<8x1xf32>
    %114 = vector.broadcast %113 : vector<8x1xf32> to vector<8x8xf32>
    %115 = arith.subf %111, %114 : vector<8x8xf32>
    %116 = math.exp %115 : vector<8x8xf32>
    %cst_56 = arith.constant dense<0.000000e+00> : vector<8xf32>
    %117 = vector.multi_reduction <add>, %116, %cst_56 [1] : vector<8x8xf32> to vector<8xf32>
    %118 = vector.shape_cast %117 : vector<8xf32> to vector<8x1xf32>
    %119 = tpu.reciprocal %118 {approx = true} : vector<8x1xf32> -> vector<8x1xf32>
    %120 = vector.broadcast %119 : vector<8x1xf32> to vector<8x8xf32>
    %121 = arith.mulf %116, %120 : vector<8x8xf32>
    %122 = arith.truncf %121 : vector<8x8xf32> to vector<8x8xbf16>
    %c3_57 = arith.constant 3 : index
    %c0_58 = arith.constant 0 : index
    %c0_59 = arith.constant 0 : index
    %123 = vector.load %arg21[%c3_57, %c0_58, %c0_59] : memref<4x8x8xbf16, #tpu.memory_space<vmem>>, vector<1x8x8xbf16>
    %124 = vector.shape_cast %123 : vector<1x8x8xbf16> to vector<8x8xbf16>
    %cst_60 = arith.constant dense<0.000000e+00> : vector<8x8xf32>
    %125 = tpu.matmul %122, %124, %cst_60 {dimension_numbers = #tpu.dot_dimension_numbers<[1], [0], [0], [1], [0, 0, 1, 1], [], []>} : vector<8x8xbf16>, vector<8x8xbf16>, vector<8x8xf32> -> vector<8x8xf32>
    %126 = arith.truncf %125 : vector<8x8xf32> to vector<8x8xbf16>
    %c0_61 = arith.constant 0 : index
    %c24 = arith.constant 24 : index
    %127 = vector.load %arg22[%c0_61, %c24] : memref<8x32xbf16, #tpu.memory_space<vmem>>, vector<8x8xbf16>
    tpu.vector_store %arg22[%c0_61, %c24], %126 {strides = array<i32>} : memref<8x32xbf16, #tpu.memory_space<vmem>>, vector<8x8xbf16>,
    %c0_62 = arith.constant 0 : index
    %c0_63 = arith.constant 0 : index
    %128 = vector.load %arg22[%c0_62, %c0_63] : memref<8x32xbf16, #tpu.memory_space<vmem>>, vector<8x32xbf16>
    %c0_64 = arith.constant 0 : index
    %c0_65 = arith.constant 0 : index
    %129 = vector.load %arg11[%c0_64, %c0_65] : memref<32x32xbf16, #tpu.memory_space<vmem>>, vector<32x32xbf16>
    %cst_66 = arith.constant dense<0.000000e+00> : vector<8x32xf32>
    %130 = tpu.matmul %128, %129, %cst_66 {dimension_numbers = #tpu.dot_dimension_numbers<[1], [0], [0], [1], [0, 0, 1, 1], [], []>} : vector<8x32xbf16>, vector<32x32xbf16>, vector<8x32xf32> -> vector<8x32xf32>
    %131 = arith.addf %4, %130 : vector<8x32xf32>
    %c0_67 = arith.constant 0 : index
    %c0_68 = arith.constant 0 : index
    %132 = vector.load %arg12[%c0_67, %c0_68] : memref<1x32xf32, #tpu.memory_space<vmem>>, vector<1x32xf32>
    %133 = vector.broadcast %132 : vector<1x32xf32> to vector<8x32xf32>
    %134 = arith.addf %131, %133 : vector<8x32xf32>
    %c0_69 = arith.constant 0 : index
    %c0_70 = arith.constant 0 : index
    %135 = vector.load %arg13[%c0_69, %c0_70] : memref<1x32xf32, #tpu.memory_space<vmem>>, vector<1x32xf32>
    %c0_71 = arith.constant 0 : index
    %c0_72 = arith.constant 0 : index
    %136 = vector.load %arg14[%c0_71, %c0_72] : memref<1x32xf32, #tpu.memory_space<vmem>>, vector<1x32xf32>
    %cst_73 = arith.constant dense<0.000000e+00> : vector<8xf32>
    %137 = vector.multi_reduction <add>, %134, %cst_73 [1] : vector<8x32xf32> to vector<8xf32>
    %138 = vector.shape_cast %137 : vector<8xf32> to vector<8x1xf32>
    %cst_74 = arith.constant 3.200000e+01 : f32
    %139 = vector.broadcast %cst_74 : f32 to vector<8x1xf32>
    %140 = arith.divf %138, %139 : vector<8x1xf32>
    %141 = vector.broadcast %140 : vector<8x1xf32> to vector<8x32xf32>
    %142 = arith.subf %134, %141 : vector<8x32xf32>
    %143 = arith.mulf %142, %142 : vector<8x32xf32>
    %cst_75 = arith.constant dense<0.000000e+00> : vector<8xf32>
    %144 = vector.multi_reduction <add>, %143, %cst_75 [1] : vector<8x32xf32> to vector<8xf32>
    %145 = vector.shape_cast %144 : vector<8xf32> to vector<8x1xf32>
    %cst_76 = arith.constant 3.200000e+01 : f32
    %146 = vector.broadcast %cst_76 : f32 to vector<8x1xf32>
    %147 = arith.divf %145, %146 : vector<8x1xf32>
    %148 = vector.broadcast %140 : vector<8x1xf32> to vector<8x32xf32>
    %149 = arith.subf %134, %148 : vector<8x32xf32>
    %cst_77 = arith.constant 9.99999974E-6 : f32
    %150 = vector.broadcast %cst_77 : f32 to vector<8x1xf32>
    %151 = arith.addf %147, %150 : vector<8x1xf32>
    %152 = math.rsqrt %151 : vector<8x1xf32>
    %153 = vector.broadcast %152 : vector<8x1xf32> to vector<8x32xf32>
    %154 = arith.mulf %149, %153 : vector<8x32xf32>
    %155 = vector.broadcast %135 : vector<1x32xf32> to vector<8x32xf32>
    %156 = arith.mulf %154, %155 : vector<8x32xf32>
    %157 = vector.broadcast %136 : vector<1x32xf32> to vector<8x32xf32>
    %158 = arith.addf %156, %157 : vector<8x32xf32>
    %159 = arith.truncf %158 : vector<8x32xf32> to vector<8x32xbf16>
    %cst_78 = arith.constant 0.000000e+00 : f32
    %160 = vector.broadcast %cst_78 : f32 to vector<8x32xf32>
    %c0_i32_79 = arith.constant 0 : i32
    %161 = arith.index_cast %c0_i32_79 : i32 to index
    %c0_80 = arith.constant 0 : index
    %c0_81 = arith.constant 0 : index
    %162 = vector.load %arg15[%161, %c0_80, %c0_81] : memref<1x32x64xbf16, #tpu.memory_space<vmem>>, vector<1x32x64xbf16>
    %163 = vector.shape_cast %162 : vector<1x32x64xbf16> to vector<32x64xbf16>
    %cst_82 = arith.constant dense<0.000000e+00> : vector<8x64xf32>
    %164 = tpu.matmul %159, %163, %cst_82 {dimension_numbers = #tpu.dot_dimension_numbers<[1], [0], [0], [1], [0, 0, 1, 1], [], []>} : vector<8x32xbf16>, vector<32x64xbf16>, vector<8x64xf32> -> vector<8x64xf32>
    %165 = arith.index_cast %c0_i32_79 : i32 to index
    %c0_83 = arith.constant 0 : index
    %c0_84 = arith.constant 0 : index
    %166 = vector.load %arg16[%165, %c0_83, %c0_84] : memref<1x1x64xf32, #tpu.memory_space<vmem>>, vector<1x1x64xf32>
    %167 = vector.shape_cast %166 : vector<1x1x64xf32> to vector<1x64xf32>
    %168 = vector.broadcast %167 : vector<1x64xf32> to vector<8x64xf32>
    %169 = arith.addf %164, %168 : vector<8x64xf32>
    %cst_85 = arith.constant 0.000000e+00 : f32
    %170 = vector.broadcast %cst_85 : f32 to vector<8x64xf32>
    %171 = arith.maximumf %169, %170 : vector<8x64xf32>
    %172 = arith.truncf %171 : vector<8x64xf32> to vector<8x64xbf16>
    %173 = arith.index_cast %c0_i32_79 : i32 to index
    %c0_86 = arith.constant 0 : index
    %c0_87 = arith.constant 0 : index
    %174 = vector.load %arg17[%173, %c0_86, %c0_87] : memref<1x64x32xbf16, #tpu.memory_space<vmem>>, vector<1x64x32xbf16>
    %175 = vector.shape_cast %174 : vector<1x64x32xbf16> to vector<64x32xbf16>
    %cst_88 = arith.constant dense<0.000000e+00> : vector<8x32xf32>
    %176 = tpu.matmul %172, %175, %cst_88 {dimension_numbers = #tpu.dot_dimension_numbers<[1], [0], [0], [1], [0, 0, 1, 1], [], []>} : vector<8x64xbf16>, vector<64x32xbf16>, vector<8x32xf32> -> vector<8x32xf32>
    %177 = arith.addf %160, %176 : vector<8x32xf32>
    %c1_i32 = arith.constant 1 : i32
    %178 = arith.addf %134, %177 : vector<8x32xf32>
    %c0_89 = arith.constant 0 : index
    %c0_90 = arith.constant 0 : index
    %179 = vector.load %arg18[%c0_89, %c0_90] : memref<1x32xf32, #tpu.memory_space<vmem>>, vector<1x32xf32>
    %180 = vector.broadcast %179 : vector<1x32xf32> to vector<8x32xf32>
    %181 = arith.addf %178, %180 : vector<8x32xf32>
    %c0_91 = arith.constant 0 : index
    %c0_92 = arith.constant 0 : index
    %c0_93 = arith.constant 0 : index
    %182 = vector.load %arg19[%c0_91, %c0_92, %c0_93] : memref<1x8x32xf32, #tpu.memory_space<vmem>>, vector<1x8x32xf32>
    %183 = vector.shape_cast %182 : vector<1x8x32xf32> to vector<8x32xf32>
    %184 = vector.shape_cast %181 : vector<8x32xf32> to vector<1x8x32xf32>
    tpu.vector_store %arg19[%c0_91, %c0_92, %c0_93], %184 {strides = array<i32>} : memref<1x8x32xf32, #tpu.memory_space<vmem>>, vector<1x8x32xf32>,
    return
  }
  func.func @transform_0(%arg0: i32, %arg1: i32) -> (i32, i32, i32) {
    %c0_i32 = arith.constant 0 : i32
    %c0_i32_0 = arith.constant 0 : i32
    return %arg0, %arg1, %c0_i32 : i32, i32, i32
  }
  func.func @transform_1(%arg0: i32, %arg1: i32) -> (i32, i32, i32) {
    %c0_i32 = arith.constant 0 : i32
    %c0_i32_0 = arith.constant 0 : i32
    %c0_i32_1 = arith.constant 0 : i32
    return %arg0, %c0_i32, %c0_i32_0 : i32, i32, i32
  }
  func.func @transform_2(%arg0: i32, %arg1: i32) -> (i32, i32, i32) {
    %c0_i32 = arith.constant 0 : i32
    %c0_i32_0 = arith.constant 0 : i32
    %c0_i32_1 = arith.constant 0 : i32
    return %arg0, %c0_i32, %c0_i32_0 : i32, i32, i32
  }
  func.func @transform_3(%arg0: i32, %arg1: i32) -> (i32, i32) {
    %c0_i32 = arith.constant 0 : i32
    %c0_i32_0 = arith.constant 0 : i32
    %c0_i32_1 = arith.constant 0 : i32
    return %c0_i32, %c0_i32_0 : i32, i32
  }
  func.func @transform_4(%arg0: i32, %arg1: i32) -> (i32, i32) {
    %c0_i32 = arith.constant 0 : i32
    %c0_i32_0 = arith.constant 0 : i32
    %c0_i32_1 = arith.constant 0 : i32
    return %c0_i32, %c0_i32_0 : i32, i32
  }
  func.func @transform_5(%arg0: i32, %arg1: i32) -> (i32, i32) {
    %c0_i32 = arith.constant 0 : i32
    %c0_i32_0 = arith.constant 0 : i32
    %c0_i32_1 = arith.constant 0 : i32
    return %c0_i32, %c0_i32_0 : i32, i32
  }
  func.func @transform_6(%arg0: i32, %arg1: i32) -> (i32, i32) {
    %c0_i32 = arith.constant 0 : i32
    %c0_i32_0 = arith.constant 0 : i32
    %c0_i32_1 = arith.constant 0 : i32
    return %c0_i32, %c0_i32_0 : i32, i32
  }
  func.func @transform_7(%arg0: i32, %arg1: i32) -> (i32, i32) {
    %c0_i32 = arith.constant 0 : i32
    %c0_i32_0 = arith.constant 0 : i32
    %c0_i32_1 = arith.constant 0 : i32
    return %c0_i32, %c0_i32_0 : i32, i32
  }
  func.func @transform_8(%arg0: i32, %arg1: i32) -> (i32, i32) {
    %c0_i32 = arith.constant 0 : i32
    %c0_i32_0 = arith.constant 0 : i32
    %c0_i32_1 = arith.constant 0 : i32
    return %c0_i32, %c0_i32_0 : i32, i32
  }
  func.func @transform_9(%arg0: i32, %arg1: i32) -> (i32, i32) {
    %c0_i32 = arith.constant 0 : i32
    %c0_i32_0 = arith.constant 0 : i32
    %c0_i32_1 = arith.constant 0 : i32
    return %c0_i32, %c0_i32_0 : i32, i32
  }
  func.func @transform_10(%arg0: i32, %arg1: i32) -> (i32, i32) {
    %c0_i32 = arith.constant 0 : i32
    %c0_i32_0 = arith.constant 0 : i32
    %c0_i32_1 = arith.constant 0 : i32
    return %c0_i32, %c0_i32_0 : i32, i32
  }
  func.func @transform_11(%arg0: i32, %arg1: i32) -> (i32, i32) {
    %c0_i32 = arith.constant 0 : i32
    %c0_i32_0 = arith.constant 0 : i32
    %c0_i32_1 = arith.constant 0 : i32
    return %c0_i32, %c0_i32_0 : i32, i32
  }
  func.func @transform_12(%arg0: i32, %arg1: i32) -> (i32, i32) {
    %c0_i32 = arith.constant 0 : i32
    %c0_i32_0 = arith.constant 0 : i32
    %c0_i32_1 = arith.constant 0 : i32
    return %c0_i32, %c0_i32_0 : i32, i32
  }
  func.func @transform_13(%arg0: i32, %arg1: i32) -> (i32, i32, i32) {
    %c0_i32 = arith.constant 0 : i32
    %c0_i32_0 = arith.constant 0 : i32
    %c0_i32_1 = arith.constant 0 : i32
    %c0_i32_2 = arith.constant 0 : i32
    return %c0_i32, %c0_i32_0, %c0_i32_1 : i32, i32, i32
  }
  func.func @transform_14(%arg0: i32, %arg1: i32) -> (i32, i32, i32) {
    %c0_i32 = arith.constant 0 : i32
    %c0_i32_0 = arith.constant 0 : i32
    %c0_i32_1 = arith.constant 0 : i32
    %c0_i32_2 = arith.constant 0 : i32
    return %c0_i32, %c0_i32_0, %c0_i32_1 : i32, i32, i32
  }
  func.func @transform_15(%arg0: i32, %arg1: i32) -> (i32, i32, i32) {
    %c0_i32 = arith.constant 0 : i32
    %c0_i32_0 = arith.constant 0 : i32
    %c0_i32_1 = arith.constant 0 : i32
    %c0_i32_2 = arith.constant 0 : i32
    return %c0_i32, %c0_i32_0, %c0_i32_1 : i32, i32, i32
  }
  func.func @transform_16(%arg0: i32, %arg1: i32) -> (i32, i32) {
    %c0_i32 = arith.constant 0 : i32
    %c0_i32_0 = arith.constant 0 : i32
    %c0_i32_1 = arith.constant 0 : i32
    return %c0_i32, %c0_i32_0 : i32, i32
  }
  func.func @transform_17(%arg0: i32, %arg1: i32) -> (i32, i32, i32) {
    %c0_i32 = arith.constant 0 : i32
    %c0_i32_0 = arith.constant 0 : i32
    return %arg0, %arg1, %c0_i32 : i32, i32, i32
  }
}

</mosaic_0001>

<bundles_post_ra>
// kernel: tpu_custom_call.1
= control target key start
LH: loop header
LB: loop body
LE: loop exit
PB: predicated region body
PF: predicated region fallthrough
CT: control target
= control target key end

     0   :  { %s2996_s0 = inlined_call_operand.vmem [shape: f32[2,8,32], index: 0, kind: input, shape index: {}]   ;;  %s2997_s1 = inlined_call_operand.vmem [shape: f32[2,8,32], index: 1, kind: input, shape index: {}]   ;;  %s2998_s2 = inlined_call_operand.hbm [shape: f32[2,1,8], index: 2, kind: input, shape index: {}]   ;;  %s2999_s3 = inlined_call_operand.hbm [shape: f32[1,32], index: 3, kind: input, shape index: {}]   ;;  %s3000_s4 = inlined_call_operand.hbm [shape: f32[1,32], index: 4, kind: input, shape index: {}]   ;;  %s3001_s5 = inlined_call_operand.vmem [shape: bf16[32,32], index: 5, kind: input, shape index: {}]   ;;  %s3002_s6 = inlined_call_operand.hbm [shape: f32[1,32], index: 6, kind: input, shape index: {}]   ;;  %s3003_s7 = inlined_call_operand.hbm [shape: bf16[32,64], index: 7, kind: input, shape index: {}]   ;;  %s3004_s8 = inlined_call_operand.hbm [shape: f32[1,64], index: 8, kind: input, shape index: {}]   ;;  %s3005_s9 = inlined_call_operand.vmem [shape: bf16[32,32], index: 9, kind: input, shape index: {}]   ;;  %s3006_s10 = inlined_call_operand.vmem [shape: f32[1,32], index: 10, kind: input, shape index: {}]   ;;  %s3007_s11 = inlined_call_operand.vmem [shape: f32[1,32], index: 11, kind: input, shape index: {}]   ;;  %s3008_s12 = inlined_call_operand.vmem [shape: f32[1,32], index: 12, kind: input, shape index: {}]   ;;  %s3009_s13 = inlined_call_operand.hbm [shape: bf16[1,32,64], index: 13, kind: input, shape index: {}]   ;;  %s3010_s14 = inlined_call_operand.vmem [shape: f32[1,1,64], index: 14, kind: input, shape index: {}]   ;;  %s3011_s15 = inlined_call_operand.vmem [shape: bf16[1,64,32], index: 15, kind: input, shape index: {}]   ;;  %s3012_s16 = inlined_call_operand.vmem [shape: f32[1,32], index: 16, kind: input, shape index: {}]   ;;  %s3013_s17 = inlined_call_operand.hbm [shape: f32[2,8,32], index: 17, kind: output, shape index: {}]  }
   0x1   :  { %3020 = sst [smem:[#allocation24_spill]] %s2996_s0 }
   0x2   :  { %3021 = sst [smem:[#allocation25_spill]] %s2997_s1 }
   0x3   :  { %3022 = sst [smem:[#allocation26_spill]] %s2999_s3 }
   0x4   :  { %3023 = sst [smem:[#allocation27_spill]] %s3000_s4 }
   0x5   :  { %3024 = sst [smem:[#allocation28_spill]] %s3002_s6 }
   0x6   :  { %3025 = sst [smem:[#allocation29_spill]] %s3003_s7 }
   0x7   :  { %3026 = sst [smem:[#allocation30_spill]] %s3004_s8 }
   0x8   :  { %3027 = sst [smem:[#allocation31_spill]] %s3008_s12 }
   0x9   :  { %3028 = sst [smem:[#allocation32_spill]] %s3009_s13 }
   0xa   :  { %3029 = sst [smem:[#allocation33_spill]] %s3010_s14 }
   0xb   :  { %3030 = sst [smem:[#allocation34_spill]] %s3012_s16 }
   0xc   :  { %3031 = sst [smem:[#allocation35_spill]] %s3013_s17 }
   0xd   :  { %22 = vsyncpa [#allocation6], 0 }
   0xe   :  { %24 = vsyncpa [#allocation6 + $0x1], 0 }
   0xf   :  { %25 = vsyncpa [#allocation9], 0 }
  0x10   :  { %26 = vsyncpa [#allocation12], 0 }
  0x11   :  { %27 = vsyncpa [#allocation15], 0 }
  0x12   :  { %28 = vsyncpa [#allocation7], 0 }
  0x13   :  { %30 = vsyncpa [#allocation7 + $0x1], 0  ;;  %s2607_s24 = smov 0   ;;  %s2609_s25 = smov 0  }
  0x14   :  { %s2611_s26 = smov 0   ;;  %s2613_s27 = smov 0  }
  0x15   :  { %s2615_s28 = smov 0   ;;  %s2617_s29 = smov 0  }
  0x16 LB: > { %s3014_s0 = sadd.s32 4294967295, %s2493_s29   ;;  %p1853_p0 = scmp.ge.s32.totalorder %s2493_s29, 1  ;;  %s2493_s29 = sphi %s2617_s29, %s36_s29   ;;  %s2489_s28 = sphi %s2615_s28, %s3064_s28   ;;  %s2485_s27 = sphi %s2613_s27, %s3063_s27   ;;  %s2481_s26 = sphi %s2611_s26, %s3062_s26   ;;  %s2477_s25 = sphi %s2609_s25, %s3061_s25   ;;  %s2473_s24 = sphi %s2607_s24, %s3060_s24  }
  0x17   : > { %p2641_p1 = scmp.eq.s32.totalorder %s3014_s0, 0  ;;  %p455_p2 = scmp.lt.s32.totalorder %s2493_s29, 3 }
  0x18   : > { %s2495_s19 = smov [#allocation8]   ;;  %s2496_s20 = smov [#allocation11]  }
  0x19   : > { %s3032_s30 = scalar_select %p2641_p1, 1, 0 }
  0x1a   : > { %p2646_p3 = pnand %p1853_p0, %p455_p2  ;;  %s475_s1 = sshll.u32 %s2495_s19, 4  ;;  %s476_s1 = int_to_ptr.vmem [resolvable:$true] %s475_s1 }
  0x1b   : > { %s500_s21 = sshll.u32 %s2496_s20, 4  ;;  %s2497_s23 = smov [#allocation14]   ;;  %s501_s21 = int_to_ptr.vmem [resolvable:$true] %s500_s21 }
  0x1c   : > { %s3033_s18 = scalar_select %p2646_p3, 1, 0 }
  0x1d   : > { %p2074_p5 = pneg %p2646_p3  ;;  %s524_s0 = sshll.u32 %s2497_s23, 4  ;;  %s2659_s0 = int_to_ptr.vmem [resolvable:$true] %s524_s0 }
  0x1e   : > { %s2228_s17 = scalar_lea.vmem %s476_s1, 16  ;;  %s2235_s20 = scalar_lea.vmem %s476_s1, 32 }
  0x1f   : > { %p2655_p6 = pnand %p2074_p5, %p2641_p1  ;;  %p2229_p8 = scmp.ne.s32.totalorder %s476_s1, %s2228_s17 }
  0x20   : > { %p2236_p11 = scmp.lt.s32.totalorder %s476_s1, %s476_s1  ;;  %p2237_p12 = scmp.lt.s32.totalorder %s2235_s20, %s2228_s17 }
  0x21   : > { %p2663_p7 = pneg %p2655_p6 }
  0x22   : > { %p2238_p13 = por %p2237_p12, %p2236_p11 }
  0x23   : > { %p2231_p9 = pnand %p2229_p8, %p2663_p7 }
  0x25   : > { %p2232_p10 = pneg %p2231_p9 }
  0x27   : > { %p2239_p0 = pnand %p2238_p13, %p2232_p10 }
  0x29   : > { %2242 = shalt.err (!%p2239_p0)
}
  0x2a   : > { %s3036_s3 = sld [smem:[#allocation26_spill]]  ;;  %s2254_s14 = scalar_lea.vmem %s501_s21, 16 }
  0x2b   : > { %p2255_p2 = scmp.ne.s32.totalorder %s501_s21, %s2254_s14  ;;  %s2261_s12 = scalar_lea.vmem %s501_s21, 32 }
  0x2c   : > { %p2262_p8 = scmp.lt.s32.totalorder %s501_s21, %s501_s21  ;;  %p2263_p9 = scmp.lt.s32.totalorder %s2261_s12, %s2254_s14 }
  0x2d   : > { %p2257_p5 = pnand %p2255_p2, %p2663_p7 }
  0x2e   : > { %p2264_p3 = por %p2263_p9, %p2262_p8 }
  0x2f   : > { %p2258_p4 = pneg %p2257_p5 }
  0x30   : > { %2077 = dma.hbm_to_vmem [thread:$0]  (!%p2655_p6), %s3036_s3, 16, %s476_s1, [#allocation9]  }
  0x31   : > { %p2265_p1 = pnand %p2264_p3, %p2258_p4 }
  0x33   : > { %2268 = shalt.err (!%p2265_p1)
}
  0x34   : > { %s3037_s6 = sld [smem:[#allocation28_spill]]  ;;  %s2280_s16 = scalar_lea.vmem %s2659_s0, 16 }
  0x35   : > { %p2281_p10 = scmp.ne.s32.totalorder %s2659_s0, %s2280_s16  ;;  %s2287_s12 = scalar_lea.vmem %s2659_s0, 32 }
  0x36   : > { %p2288_p3 = scmp.lt.s32.totalorder %s2659_s0, %s2659_s0  ;;  %p2289_p1 = scmp.lt.s32.totalorder %s2287_s12, %s2280_s16 }
  0x37   : > { %p2283_p11 = pnand %p2281_p10, %p2663_p7 }
  0x38   : > { %p2290_p4 = por %p2289_p1, %p2288_p3 }
  0x39   : > { %p2284_p12 = pneg %p2283_p11 }
  0x3a   : > { %2083 = dma.hbm_to_vmem [thread:$0]  (!%p2655_p6), %s3037_s6, 16, %s501_s21, [#allocation12]  }
  0x3b   : > { %p2291_p13 = pnand %p2290_p4, %p2284_p12 }
  0x3d   : > { %2294 = shalt.err (!%p2291_p13)
}
  0x3e   : > { %s3038_s8 = sld [smem:[#allocation30_spill]]  ;;  %s2498_s21 = smov [#allocation10]  }
  0x3f   : > { %s486_s23 = sshll.u32 %s2498_s21, 4  ;;  %s2499_s17 = smov [#allocation13]   ;;  %s487_s23 = int_to_ptr.vmem [resolvable:$true] %s486_s23 }
  0x40   : > { %s510_s20 = sshll.u32 %s2499_s17, 4  ;;  %s2306_s3 = scalar_lea.vmem %s487_s23, 16  ;;  %s511_s20 = int_to_ptr.vmem [resolvable:$true] %s510_s20 }
  0x41   : > { %p2307_p0 = scmp.ne.s32.totalorder %s487_s23, %s2306_s3  ;;  %s2313_s16 = scalar_lea.vmem %s487_s23, 32 }
  0x42   : > { %p2314_p8 = scmp.lt.s32.totalorder %s487_s23, %s487_s23  ;;  %p2315_p9 = scmp.lt.s32.totalorder %s2313_s16, %s2306_s3 }
  0x43   : > { %p2309_p2 = pnand %p2307_p0, %p2663_p7 }
  0x44   : > { %2089 = dma.hbm_to_vmem [thread:$0]  (!%p2655_p6), %s3038_s8, 16, %s2659_s0, [#allocation15]  }
  0x45   : > { %p2310_p5 = pneg %p2309_p2  ;;  %p2316_p10 = por %p2315_p9, %p2314_p8 }
  0x47   : > { %p2317_p11 = pnand %p2316_p10, %p2310_p5 }
  0x49   : > { %2320 = shalt.err (!%p2317_p11)
}
  0x4a   : > { %s3039_s4 = sld [smem:[#allocation27_spill]]  ;;  %s2332_s14 = scalar_lea.vmem %s511_s20, 256 }
  0x4b   : > { %p2333_p12 = scmp.ne.s32.totalorder %s511_s20, %s2332_s14  ;;  %p2340_p4 = scmp.lt.s32.totalorder %s511_s20, %s511_s20 }
  0x4c   : > { %p2341_p13 = scmp.lt.s32.totalorder %s2332_s14, %s2332_s14 }
  0x4d   : > { %p2335_p3 = pnand %p2333_p12, %p2663_p7 }
  0x4e   : > { %p2342_p0 = por %p2341_p13, %p2340_p4 }
  0x4f   : > { %p2336_p1 = pneg %p2335_p3 }
  0x50   : > { %2080 = dma.hbm_to_vmem [thread:$0]  (!%p2655_p6), %s3039_s4, 16, %s487_s23, [#allocation9]  }
  0x51   : > { %p2343_p2 = pnand %p2342_p0, %p2336_p1 }
  0x53   : > { %2346 = shalt.err (!%p2343_p2)
}
  0x54   : > { %s2500_s3 = smov 64   ;;  %s2501_s1 = smov 4  }
  0x55   : > { %s3040_s7 = sld [smem:[#allocation29_spill]]  ;;  %s2502_s23 = smov [#allocation16]  }
  0x56   : > { %s546_s16 = sshll.u32 %s2502_s23, 4  ;;  %s547_s16 = int_to_ptr.vmem [resolvable:$true] %s546_s16 }
  0x57   : > { %s2358_s12 = scalar_lea.vmem %s547_s16, 256  ;;  %p2366_p10 = scmp.lt.s32.totalorder %s547_s16, %s547_s16 }
  0x58   : > { %p2359_p5 = scmp.ne.s32.totalorder %s547_s16, %s2358_s12  ;;  %p2367_p11 = scmp.lt.s32.totalorder %s2358_s12, %s2358_s12 }
  0x5a   : > { %p2361_p8 = pnand %p2359_p5, %p2663_p7  ;;  %p2368_p12 = por %p2367_p11, %p2366_p10 }
  0x5b   : > { %2086 = dma.hbm_to_vmem [thread:$0]  (!%p2655_p6), %s3040_s7, 256, %s511_s20, [#allocation12], %s2500_s3, %s2500_s3, %s2501_s1  }
  0x5c   : > { %p2362_p9 = pneg %p2361_p8 }
  0x5e   : > { %p2369_p3 = pnand %p2368_p12, %p2362_p9 }
  0x60   : > { %2372 = shalt.err (!%p2369_p3)
}
  0x61   : > { %s3041_s13 = sld [smem:[#allocation32_spill]]  ;;  %s1852_s19 = sadd.s32 4294967294, %s2493_s29  }
  0x62   : > { %s48_s20 = sadd.s32 1, %s2489_s28  ;;  %s109_s22 = sadd.s32 1, %s2481_s26 }
  0x63   : > { %p50_p7 = scmp.ge.s32.totalorder %s48_s20, 2  ;;  %p116_p1 = scmp.ne.s32.totalorder %s2481_s26, %s2477_s25 }
  0x64   : > { %p117_p4 = scmp.eq.s32.totalorder %s2493_s29, 0  ;;  %p122_p0 = scmp.ne.s32.totalorder %s2477_s25, %s2473_s24 }
  0x65   : > { %s3066_s20 = smov (%p50_p7, %s48_s20), 0  ;;  %p3045_p5 = scmp.ne.s32.totalorder %s3032_s30, 0 }
  0x66   : > { %3042 = sst [smem:[#allocation23_spill]] %s3066_s20  ;;  %p2723_p13 = por %p117_p4, %p116_p1 }
  0x67   : > { %2092 = dma.hbm_to_vmem [thread:$0]  (!%p2655_p6), %s3041_s13, 256, %s547_s16, [#allocation15], %s2500_s3, %s2500_s3, %s2501_s1  }
  0x68   : > { %s106_s3 = ssub.s32 %s2489_s28, %s3066_s20  ;;  %s3044_s1 = sadd.s32 4294967295, %s2493_s29  }
  0x69   : > { %p442_p6 = scmp.eq.s32.totalorder %s3044_s1, 1  ;;  %p107_p2 = scmp.eq.s32.totalorder %s106_s3, 0 }
  0x6a   : > { %p2735_p8 = por %p3045_p5, %p122_p0  ;;  %p448_p10 = scmp.eq.s32.totalorder %s1852_s19, 1 }
  0x6b   : > { %p2739_p9 = por %p442_p6, %p116_p1  ;;  %p2107_p12 = scmp.lt.s32.totalorder %s2493_s29, 2 }
  0x6c   : > { %s2744_s16 = scalar_select %p107_p2, %s2481_s26, %s109_s22  }
  0x6d   : > { %p2746_p11 = por %p448_p10, %p122_p0  ;;  %s579_s0 = sand.u32 1, %s2481_s26  }
  0x6e   : > { %s1861_s14 = sshll.u32 %s2489_s28, 4  ;;  %s582_s6 = scalar_lea.vmem [#allocation5], %s579_s0 }
  0x6f   : > { %s587_s4 = scalar_lea.hbm %s2998_s2, %s1861_s14  ;;  %s589_s7 = sshll.u32 %s582_s6, 4  ;;  %s590_s7 = int_to_ptr.vmem [resolvable:$true] %s589_s7 }
  0x70   : > { %p2758_p3 = pnand %p2107_p12, %p2723_p13  ;;  %s580_s19 = scalar_lea.sflag [#allocation6], %s579_s0 }
  0x71   : > { %s2386_s22 = scalar_lea.vmem %s590_s7, 16  ;;  %s2503_s13 = smov [#allocation5]  }
  0x72   : > { %p2375_p7 = pneg %p2758_p3  ;;  %p2387_p1 = scmp.ne.s32.totalorder %s590_s7, %s2386_s22 }
  0x73   : > { %s2391_s20 = sshll.u32 %s2503_s13, 4  ;;  %s2392_s20 = int_to_ptr.vmem [resolvable:$false] %s2391_s20 }
  0x74   : > { %p2389_p4 = pnand %p2387_p1, %p2375_p7  ;;  %s2393_s14 = scalar_lea.vmem %s2392_s20, 32 }
  0x75   : > { %p2394_p6 = scmp.lt.s32.totalorder %s590_s7, %s2392_s20  ;;  %p2395_p2 = scmp.lt.s32.totalorder %s2393_s14, %s2386_s22 }
  0x76   : > { %p2390_p0 = pneg %p2389_p4 }
  0x77   : > { %p2396_p5 = por %p2395_p2, %p2394_p6 }
  0x79   : > { %p2397_p10 = pnand %p2396_p5, %p2390_p0 }
  0x7b   : > { %2400 = shalt.err (!%p2397_p10)
}
  0x7c   : > { %2096 = dma.hbm_to_vmem [thread:$0]  (!%p2758_p3), %s587_s4, 16, %s590_s7, %s580_s19  }
  0x7d   : > { %p3050_p13 = scmp.ne.s32.totalorder %s3033_s18, 0 }
  0x7e   : > { %s2769_s6 = sand.u32 (!%p3050_p13), 1, %s2477_s25  }
  0x7f   : > { %598 = sbr.rel (%p3050_p13) target bundleno = 2560 (0xa00), region = 88  ;;  %s601_s13 = scalar_lea.sflag (!%p3050_p13), [#allocation6], %s2769_s6 }
  0x80   : > { %s603_s21 = scalar_lea.vmem (!%p3050_p13), [#allocation5], %s2769_s6 }
  0x84   : > { %2452 = dma.done.wait (%p2735_p8), %s601_s13, 16  }
  0x85   : > { %2454 = vsyncadd (%p2735_p8), %s601_s13, 4294967280  ;;  %p3051_p12 = scmp.ne.s32.totalorder %s3032_s30, 0 }
  0x87   : > { %2456 = dma.done.wait (%p3051_p12), [#allocation9], 32  }
  0x88   : > { %2458 = vsyncadd (%p3051_p12), [#allocation9], 4294967264 }
  0x89   : > { %2460 = dma.done.wait (%p3051_p12), [#allocation12], 272  }
  0x8a   : > { %2462 = vsyncadd (%p3051_p12), [#allocation12], 4294967024 }
  0x8b   : > { %2464 = dma.done.wait (%p3051_p12), [#allocation15], 272  }
  0x8c   : > { %2466 = vsyncadd (%p3051_p12), [#allocation15], 4294967024  ;;  %p688_p8 = scmp.lt.s32.totalorder %s2485_s27, 1  ;;  %s3052_s20 = sld [smem:[#allocation25_spill]]  ;;  %vm707_vm0 = vcmask 261120   ;;  %v2183_v14 = vld [vmem:[#allocation13 + $0x8] sm:$0xff]  }
  0x8d   : > { %s3053_s1 = sld [smem:[#allocation24_spill]]  ;;  %v2504_v15 = vmov 0.0   ;;  %v2184_v16 = vld [vmem:[#allocation13] sm:$0xff]   ;;  %vm2505_vm1 = vmmov 0   ;;  %v1872_v24 = vld [vmem:[#allocation8] ss:$0 sm:$0xff] }
  0x8e   : > { %s689_s4 = scalar_select %p688_p8, %s2485_s27, 1  ;;  %1954 = vmatprep.subr.bf16.mxu1 %v2504_v15  ;;  %1970 = vmatprep.subr.bf16.mxu0 %v2504_v15  ;;  %v1873_v26 = vld [vmem:[#allocation10] ss:$0 sm:$0xff]  ;;  %v2186_v34 = vld [vmem:[%s3001_s5] sm:$0xff]   ;;  %v1874_v37 = vld [vmem:[#allocation14] ss:$0 sm:$0xff] }
  0x8f   : > { %1955 = vmatpush3.bf16.msra.mxu1 %v2183_v14  ;;  %1958 = vmatprep.mubr.msk.bf16.mxu1 %vm2505_vm1, %v2504_v15  ;;  %v2185_v31 = vld [vmem:[%s3001_s5 + $0x8] sm:$0xff]   ;;  %vm804_vm2 = vcmask 60416   ;;  %s2508_s8 = smov 104   ;;  %vm952_vm3 = vcmask 64512   ;;  %vm1015_vm4 = vcmask 1043456   ;;  %s2510_s18 = smov 80  }
  0x90   : > { %s1870_s7 = sshll.u32 %s689_s4, 3  ;;  %1956 = vmatprep.subr.bf16.mxu1 %v2504_v15  ;;  %1972 = vmatprep.mubr.msk.bf16.mxu0 %vm2505_vm1, %v2504_v15  ;;  %s2506_s4 = smov 120   ;;  %v1881_v44 = vld [vmem:[#allocation11] ss:$0 sm:$0xff]  ;;  %vm1180_vm5 = vcmask 126016   ;;  %vm1299_vm6 = vcmask 191616  }
  0x91   : > { %s2513_s0 = smov 8   ;;  %s2514_s22 = smov 16   ;;  %vm1418_vm7 = vcmask 257216   ;;  %vm1619_vm8 = vcmask 523264  }
  0x92   : > { %s698_s17 = scalar_lea.vmem %s3052_s20, %s1870_s7  ;;  %s2511_s20 = smov 72  }
  0x93   : > { %s694_s19 = scalar_lea.vmem %s3053_s1, %s1870_s7  ;;  %v704_v0 = vld [vmem:[%s698_s17] sm:$0xff]  ;;  %1957 = vmatpush3.bf16.msra.mxu1 %v2184_v16  ;;  %s2507_s7 = smov 112  }
  0x94   : > { %v2797_v1 = vld [vmem:[%s694_s19] sm:$0xff]  ;;  %v708_v2 = vsel %vm707_vm0, %v704_v0, 0.0  ;;  %1962 = vmatprep.subr.bf16.mxu1 %v2504_v15  ;;  %s2512_s17 = smov 88   ;;  %s2515_s14 = smov 24  }
  0x95   : > { %v847_v3 = vsel %vm707_vm0, %v2797_v1, 0.0  ;;  %709 = vadd.xlane.f32.xlu0 %v708_v2  ;;  %s3054_s1 = sld [smem:[#allocation31_spill]]  ;;  %s2516_s13 = smov [#allocation17]  }
  0x96   : > { %s3057_s30 = sld [smem:[#allocation35_spill]] }
  0x99   : > { %848 = vadd.xlane.f32.xlu0 %v847_v3  ;;  %v1885_v3 = vld [vmem:[%s603_s21] ss:$0 sm:$0xff]  ;;  %s2509_s21 = smov 96  }
 0x11e   : > { %v710_v4 = vpop.xlane.xlu0 %709 }
 0x11f   : > { %v712_v5 = vmul.f32 0.03125, %v710_v4 }
 0x121   : > { %v713_v6 = vsub.f32 %v704_v0, %v712_v5 }
 0x122   : > { %v849_v7 = vpop.xlane.xlu0 %848 }
 0x123   : > { %v851_v8 = vmul.f32 0.03125, %v849_v7  ;;  %v714_v9 = vmul.f32 %v713_v6, %v713_v6 }
 0x125   : > { %v852_v10 = vsub.f32 %v2797_v1, %v851_v8  ;;  %v715_v11 = vsel %vm707_vm0, %v714_v9, 0.0 }
 0x126   : > { %716 = vadd.xlane.f32.xlu1 %v715_v11 }
 0x127   : > { %v853_v12 = vmul.f32 %v852_v10, %v852_v10 }
 0x129   : > { %v854_v13 = vsel %vm707_vm0, %v853_v12, 0.0 }
 0x12a   : > { %855 = vadd.xlane.f32.xlu1 %v854_v13 }
 0x1af   : > { %v717_v17 = vpop.xlane.xlu1 %716 }
 0x1b0   : > { %v718_v18 = vmul.f32 0.03125, %v717_v17 }
 0x1b2   : > { %v719_v19 = vadd.f32 1e-05, %v718_v18 }
 0x1b3   : > { %v856_v20 = vpop.xlane.xlu1 %855 }
 0x1b4   : > { %2195 = vrsqrt.f32 %v719_v19  ;;  %v857_v21 = vmul.f32 0.03125, %v856_v20 }
 0x1b6   : > { %v858_v22 = vadd.f32 1e-05, %v857_v21 }
 0x1b8   : > { %2197 = vrsqrt.f32 %v858_v22 }
 0x1c1   : > { %v2196_v23 = vpop.eup %2195 }
 0x1c2   : > { %v721_v25 = vmul.f32 %v2196_v23, %v713_v6 }
 0x1c4   : > { %v728_v27 = vmul.f32 %v1872_v24, %v721_v25 }
 0x1c5   : > { %v2198_v28 = vpop.eup %2197 }
 0x1c6   : > { %v860_v29 = vmul.f32 %v2198_v28, %v852_v10  ;;  %v735_v30 = vadd.f32 %v1873_v26, %v728_v27 }
 0x1c8   : > { %v736_v32 = vpack.c.bf16 %v735_v30, %v735_v30  ;;  %v867_v33 = vmul.f32 %v1872_v24, %v860_v29 }
 0x1ca   : > { %1959 = vmatmul.mubr.msk.bf16.vlgmr.msra.gmra.mxu1 %vm707_vm0, %v736_v32  ;;  %v874_v35 = vadd.f32 %v1873_v26, %v867_v33 }
 0x1cb   : > { %1963 = vmatpush3.bf16.msra.mxu1 %v2185_v31  ;;  %1966 = vmatprep.mubr.msk.bf16.mxu1 %vm2505_vm1, %v2504_v15 }
 0x1cc   : > { %1964 = vmatprep.subr.bf16.mxu1 %v2504_v15  ;;  %v875_v36 = vpack.c.bf16 %v874_v35, %v874_v35 }
 0x1cf   : > { %1965 = vmatpush3.bf16.msra.mxu1 %v2186_v34 }
 0x1d0   : > { %1976 = vmatprep.subr.bf16.mxu1 %v2504_v15 }
 0x1d2   : > { %1967 = vmatmul.mubr.msk.bf16.vlgmr.msra.gmra.mxu1 %vm707_vm0, %v875_v36 }
 0x1d3   : > { %1978 = vmatprep.mubr.msk.bf16.mxu1 %vm2505_vm1, %v2504_v15 }
 0x28a   : > { %v797_v38 = vpop.f32.mrf.mxu1 }
 0x28b   : > { %v798_v39 = vadd.f32 %v1874_v37, %v797_v38 }
 0x28c   : > { %v1960_v40 = vpop.f32.mrf.mxu1 }
 0x28d   : > { %v2827_v41 = vpack.c.bf16 %v798_v39, %v798_v39 }
 0x28e   : > { %v800_v42 = vpop.f32.mrf.mxu1 }
 0x28f   : > { %805 = vst.msk [vmem:[#allocation2] sm:$0xf] %vm804_vm2, %v2827_v41  ;;  %813 = vrot.lane.b32.xlu0 %v2827_v41, %s2506_s4  ;;  %823 = vrot.lane.b32.xlu1 %v2827_v41, %s2507_s7 }
 0x290   : > { %v1961_v43 = vpop.f32.mrf.mxu1 }
 0x292   : > { %v936_v45 = vpop.f32.mrf.mxu1 }
 0x293   : > { %v937_v46 = vadd.f32 %v1881_v44, %v936_v45  ;;  %833 = vrot.lane.b32.xlu1 %v2827_v41, %s2508_s8 }
 0x294   : > { %v1968_v47 = vpop.f32.mrf.mxu1 }
 0x295   : > { %v942_v48 = vmul.f32 0.35355338, %v937_v46 }
 0x296   : > { %v939_v49 = vpop.f32.mrf.mxu1  ;;  %v945_v50 = vld [vmem:[#allocation2] sm:$0xf] }
 0x297   : > { %v943_v51 = vpack.c.bf16 %v942_v48, %v942_v48  ;;  %v957_v52 = vsel %vm952_vm3, %v945_v50, 0 }
 0x298   : > { %v1969_v53 = vpop.f32.mrf.mxu1  ;;  %1971 = vmatpush3.bf16.xpose.msra.mxu0 %v957_v52 }
 0x299   : > { %1184 = vrot.lane.b32.xlu0 %v943_v51, %s2507_s7  ;;  %1065 = vrot.lane.b32.xlu1 %v943_v51, %s2506_s4  ;;  %s3055_s7 = sld [smem:[#allocation33_spill]]  ;;  %s2405_s4 = sshll.u32 %s2516_s13, 4  ;;  %s2406_s4 = int_to_ptr.vmem [resolvable:$false] %s2405_s4 }
 0x29a   : > { %1982 = vmatprep.subr.bf16.mxu0 %v2504_v15 }
 0x29d   : > { %1303 = vrot.lane.b32.xlu1 %v943_v51, %s2508_s8  ;;  %s1869_s8 = sshll.u32 %s2769_s6, 3 }
 0x29f   : > { %1973 = vmatmul.mubr.msk.bf16.vlgmr.msra.gmra.mxu0 %vm952_vm3, %v943_v51 }
 0x2a0   : > { %1984 = vmatprep.mubr.msk.bf16.mxu0 %vm2505_vm1, %v2504_v15 }
 0x301   : > { %v824_v54 = vpop.permute.xlu1 %823  ;;  %v814_v55 = vpop.permute.xlu0 %813 }
 0x302   : > { %827 = vst.msk [vmem:[#allocation2 + $0x8] sm:$0xf] %vm804_vm2, %v824_v54  ;;  %817 = vst.msk [vmem:[#allocation2 + $0x4] sm:$0xf] %vm804_vm2, %v814_v55 }
 0x305   : > { %v834_v56 = vpop.permute.xlu1 %833 }
 0x306   : > { %837 = vst.msk [vmem:[#allocation2 + $0xc] sm:$0xf] %vm804_vm2, %v834_v56 }
 0x309   : > { %v1063_v57 = vld [vmem:[#allocation2 + $0x4] sm:$0xf]  ;;  %v1183_v59 = vld [vmem:[#allocation2 + $0x8] sm:$0xf] }
 0x30a   : > { %v1071_v58 = vsel %vm952_vm3, %v1063_v57, 0  ;;  %v1190_v61 = vsel %vm952_vm3, %v1183_v59, 0 }
 0x30b   : > { %1983 = vmatpush3.bf16.xpose.msra.mxu0 %v1071_v58  ;;  %v1066_v60 = vpop.permute.xlu1 %1065  ;;  %v1185_v63 = vpop.permute.xlu0 %1184 }
 0x30c   : > { %1994 = vmatprep.subr.bf16.mxu0 %v2504_v15 }
 0x30d   : > { %v1302_v62 = vld [vmem:[#allocation2 + $0xc] sm:$0xf] }
 0x30e   : > { %v1309_v0 = vsel %vm952_vm3, %v1302_v62, 0 }
 0x30f   : > { %v1304_v2 = vpop.permute.xlu1 %1303 }
 0x312   : > { %1985 = vmatmul.mubr.msk.bf16.vlgmr.msra.gmra.mxu0 %vm952_vm3, %v1066_v60 }
 0x313   : > { %1995 = vmatpush3.bf16.xpose.msra.mxu0 %v1190_v61  ;;  %1996 = vmatprep.mubr.msk.bf16.mxu0 %vm2505_vm1, %v2504_v15 }
 0x314   : > { %2006 = vmatprep.subr.bf16.mxu0 %v2504_v15 }
 0x31a   : > { %1997 = vmatmul.mubr.msk.bf16.vlgmr.msra.gmra.mxu0 %vm952_vm3, %v1185_v63 }
 0x31b   : > { %2007 = vmatpush3.bf16.xpose.msra.mxu0 %v1309_v0  ;;  %2008 = vmatprep.mubr.msk.bf16.mxu0 %vm2505_vm1, %v2504_v15 }
 0x31c   : > { %2018 = vmatprep.subr.bf16.mxu0 %v2504_v15 }
 0x322   : > { %2009 = vmatmul.mubr.msk.bf16.vlgmr.msra.gmra.mxu0 %vm952_vm3, %v1304_v2 }
 0x323   : > { %2022 = vmatprep.mubr.msk.bf16.mxu0 %vm2505_vm1, %v2504_v15 }
 0x35f   : > { %v993_v4 = vpop.f32.mrf.mxu0 }
 0x360   : > { %v994_v5 = vadd.f32 %v1885_v3, %v993_v4 }
 0x361   : > { %v1974_v6 = vpop.f32.mrf.mxu0 }
 0x362   : > { %v999_v7 = vsel %vm952_vm3, %v994_v5, -inf }
 0x363   : > { %1000 = vmax.xlane.f32.xlu0 %v999_v7  ;;  %v996_v8 = vpop.f32.mrf.mxu0 }
 0x365   : > { %v1975_v9 = vpop.f32.mrf.mxu0 }
 0x3d2   : > { %v1107_v10 = vpop.f32.mrf.mxu0 }
 0x3d3   : > { %v1108_v11 = vadd.f32 %v1885_v3, %v1107_v10 }
 0x3d4   : > { %v1986_v12 = vpop.f32.mrf.mxu0 }
 0x3d5   : > { %v1113_v13 = vsel %vm952_vm3, %v1108_v11, -inf }
 0x3d6   : > { %1114 = vmax.xlane.f32.xlu1 %v1113_v13  ;;  %v1110_v14 = vpop.f32.mrf.mxu0 }
 0x3d8   : > { %v1987_v16 = vpop.f32.mrf.mxu0 }
 0x3da   : > { %v1226_v17 = vpop.f32.mrf.mxu0 }
 0x3db   : > { %v1227_v18 = vadd.f32 %v1885_v3, %v1226_v17 }
 0x3dc   : > { %v1998_v19 = vpop.f32.mrf.mxu0 }
 0x3dd   : > { %v1232_v20 = vsel %vm952_vm3, %v1227_v18, -inf }
 0x3de   : > { %1233 = vmax.xlane.f32.xlu0 %v1232_v20  ;;  %v1229_v21 = vpop.f32.mrf.mxu0 }
 0x3e0   : > { %v1999_v22 = vpop.f32.mrf.mxu0 }
 0x3e2   : > { %v1345_v23 = vpop.f32.mrf.mxu0 }
 0x3e3   : > { %v1346_v24 = vadd.f32 %v1885_v3, %v1345_v23 }
 0x3e4   : > { %v2010_v25 = vpop.f32.mrf.mxu0 }
 0x3e5   : > { %v1351_v26 = vsel %vm952_vm3, %v1346_v24, -inf  ;;  %v2187_v25 = vld [vmem:[%s3005_s9 + $0x8] sm:$0xff]  }
 0x3e6   : > { %1352 = vmax.xlane.f32.xlu0 %v1351_v26  ;;  %v1348_v27 = vpop.f32.mrf.mxu0  ;;  %2019 = vmatpush3.bf16.msra.mxu0 %v2187_v25 }
 0x3e7   : > { %809 = vrot.lane.b32.xlu1 %v2827_v41, %s2509_s21  ;;  %v2188_v27 = vld [vmem:[%s3005_s9] sm:$0xff]   ;;  %2020 = vmatprep.subr.bf16.mxu0 %v2504_v15 }
 0x3e8   : > { %v2011_v28 = vpop.f32.mrf.mxu0 }
 0x3ea   : > { %2021 = vmatpush3.bf16.msra.mxu0 %v2188_v27 }
 0x3eb   : > { %2034 = vmatprep.subr.bf16.mxu0 %v2504_v15 }
 0x3ec   : > { %v1001_v29 = vpop.xlane.xlu0 %1000 }
 0x3ed   : > { %v1002_v30 = vsub.f32 %v994_v5, %v1001_v29 }
 0x3ef   : > { %v1003_v31 = vmul.f32 1.442695, %v1002_v30 }
 0x3f1   : > { %2199 = vpow2.f32 %v1003_v31 }
 0x3fe   : > { %v2200_v32 = vpop.eup %2199 }
 0x3ff   : > { %v1005_v33 = vsel %vm952_vm3, %v2200_v32, 0.0 }
 0x400   : > { %1006 = vadd.xlane.f32.xlu0 %v1005_v33 }
 0x45f   : > { %v1115_v34 = vpop.xlane.xlu1 %1114 }
 0x460   : > { %v1116_v35 = vsub.f32 %v1108_v11, %v1115_v34 }
 0x462   : > { %v1117_v36 = vmul.f32 1.442695, %v1116_v35 }
 0x463   : > { %v810_v37 = vpop.permute.xlu1 %809 }
 0x464   : > { %2201 = vpow2.f32 %v1117_v36  ;;  %812 = vst.msk [vmem:[#allocation3] sm:$0xf] %vm804_vm2, %v810_v37 }
 0x467   : > { %v1234_v38 = vpop.xlane.xlu0 %1233 }
 0x468   : > { %v1235_v39 = vsub.f32 %v1227_v18, %v1234_v38 }
 0x46a   : > { %v1236_v40 = vmul.f32 1.442695, %v1235_v39 }
 0x46b   : > { %v1011_v42 = vld [vmem:[#allocation3] sm:$0xf] }
 0x46c   : > { %2203 = vpow2.f32 %v1236_v40  ;;  %v1017_v43 = vsel %vm1015_vm4, %v1011_v42, 0 }
 0x46d   : > { %1977 = vmatpush3.bf16.msra.mxu1 %v1017_v43  ;;  %v1900_v43 = vld [vmem:[%s3006_s10] ss:$0 sm:$0xff] }
 0x46e   : > { %1988 = vmatprep.subr.bf16.mxu1 %v2504_v15 }
 0x46f   : > { %v1353_v44 = vpop.xlane.xlu0 %1352 }
 0x470   : > { %v1354_v45 = vsub.f32 %v1346_v24, %v1353_v44 }
 0x471   : > { %v2202_v46 = vpop.eup %2201 }
 0x472   : > { %v1355_v47 = vmul.f32 1.442695, %v1354_v45  ;;  %v1119_v48 = vsel %vm952_vm3, %v2202_v46, 0.0 }
 0x473   : > { %1120 = vadd.xlane.f32.xlu1 %v1119_v48 }
 0x474   : > { %2205 = vpow2.f32 %v1355_v47 }
 0x479   : > { %v2204_v49 = vpop.eup %2203 }
 0x47a   : > { %v1238_v50 = vsel %vm952_vm3, %v2204_v49, 0.0 }
 0x47b   : > { %1239 = vadd.xlane.f32.xlu0 %v1238_v50 }
 0x481   : > { %v2206_v51 = vpop.eup %2205 }
 0x482   : > { %v1357_v52 = vsel %vm952_vm3, %v2206_v51, 0.0 }
 0x483   : > { %1358 = vadd.xlane.f32.xlu0 %v1357_v52 }
 0x484   : > { %828 = vrot.lane.b32.xlu1 %v2827_v41, %s2510_s18 }
 0x488   : > { %838 = vrot.lane.b32.xlu1 %v2827_v41, %s2511_s20  ;;  %s3056_s20 = sld [smem:[#allocation34_spill]] }
 0x489   : > { %v1007_v53 = vpop.xlane.xlu0 %1006 }
 0x48a   : > { %2207 = vrcp.f32 %v1007_v53 }
 0x497   : > { %v2208_v54 = vpop.eup %2207 }
 0x498   : > { %v1009_v55 = vmul.f32 %v2208_v54, %v2200_v32 }
 0x499   : > { %818 = vrot.lane.b32.xlu0 %v2827_v41, %s2512_s17  ;;  %s1914_s17 = sshll.u32 %s2485_s27, 7  ;;  %s1674_s27 = scalar_lea.sflag [#allocation7], %s2769_s6 }
 0x49a   : > { %v1010_v56 = vpack.c.bf16 %v1009_v55, %v1009_v55  ;;  %v2189_v55 = vld [vmem:[#allocation16 + $0x8] sm:$0xff]  }
 0x49c   : > { %1979 = vmatmul.mubr.msk.bf16.vlgmr.msra.gmra.mxu1 %vm952_vm3, %v1010_v56  ;;  %v2190_v56 = vld [vmem:[#allocation16] sm:$0xff]  }
 0x49d   : > { %1990 = vmatprep.mubr.msk.bf16.mxu1 %vm2505_vm1, %v2504_v15 }
 0x4fc   : > { %v1121_v57 = vpop.xlane.xlu1 %1120 }
 0x4fd   : > { %2209 = vrcp.f32 %v1121_v57  ;;  %v2192_v57 = vld [vmem:[%s3011_s15 + $0x10] sm:$0xff]  }
 0x500   : > { %v829_v58 = vpop.permute.xlu1 %828 }
 0x501   : > { %832 = vst.msk [vmem:[#allocation3 + $0x8] sm:$0xf] %vm804_vm2, %v829_v58 }
 0x504   : > { %v839_v59 = vpop.permute.xlu1 %838  ;;  %v1240_v60 = vpop.xlane.xlu0 %1239 }
 0x505   : > { %842 = vst.msk [vmem:[#allocation3 + $0xc] sm:$0xf] %vm804_vm2, %v839_v59  ;;  %2211 = vrcp.f32 %v1240_v60 }
 0x508   : > { %v1245_v3 = vld [vmem:[#allocation3 + $0x8] sm:$0xf] }
 0x509   : > { %v1250_v6 = vsel %vm1015_vm4, %v1245_v3, 0 }
 0x50a   : > { %v2210_v41 = vpop.eup %2209 }
 0x50b   : > { %v1123_v63 = vmul.f32 %v2210_v41, %v2202_v46 }
 0x50c   : > { %v1359_v61 = vpop.xlane.xlu0 %1358  ;;  %v1364_v8 = vld [vmem:[#allocation3 + $0xc] sm:$0xf] }
 0x50d   : > { %2213 = vrcp.f32 %v1359_v61  ;;  %v1124_v4 = vpack.c.bf16 %v1123_v63, %v1123_v63  ;;  %v1369_v11 = vsel %vm1015_vm4, %v1364_v8, 0  ;;  %v1902_v63 = vld [vmem:[%s3054_s1] ss:$0 sm:$0xff] }
 0x510   : > { %v819_v62 = vpop.permute.xlu0 %818 }
 0x511   : > { %822 = vst.msk [vmem:[#allocation3 + $0x4] sm:$0xf] %vm804_vm2, %v819_v62  ;;  %v1901_v62 = vld [vmem:[%s3007_s11] ss:$0 sm:$0xff] }
 0x512   : > { %v2212_v5 = vpop.eup %2211 }
 0x513   : > { %v1242_v7 = vmul.f32 %v2212_v5, %v2204_v49  ;;  %v2194_v5 = vld [vmem:[%s3011_s15] sm:$0xff]  }
 0x515   : > { %v1243_v9 = vpack.c.bf16 %v1242_v7, %v1242_v7 }
 0x518   : > { %v1126_v0 = vld [vmem:[#allocation3 + $0x4] sm:$0xf] }
 0x519   : > { %v1131_v2 = vsel %vm1015_vm4, %v1126_v0, 0 }
 0x51a   : > { %1989 = vmatpush3.bf16.msra.mxu1 %v1131_v2  ;;  %v2214_v10 = vpop.eup %2213 }
 0x51b   : > { %2000 = vmatprep.subr.bf16.mxu1 %v2504_v15  ;;  %v1361_v12 = vmul.f32 %v2214_v10, %v2206_v51 }
 0x51d   : > { %1991 = vmatmul.mubr.msk.bf16.vlgmr.msra.gmra.mxu1 %vm952_vm3, %v1124_v4  ;;  %v1362_v13 = vpack.c.bf16 %v1361_v12, %v1361_v12  ;;  %v2193_v4 = vld [vmem:[%s3011_s15 + $0x8] sm:$0xff]  }
 0x51e   : > { %2001 = vmatpush3.bf16.msra.mxu1 %v1250_v6  ;;  %2002 = vmatprep.mubr.msk.bf16.mxu1 %vm2505_vm1, %v2504_v15  ;;  %v1903_v6 = vld [vmem:[%s3055_s7] ss:$0 sm:$0xff]  ;;  %s2407_s7 = scalar_lea.vmem %s2406_s4, 256 }
 0x51f   : > { %2012 = vmatprep.subr.bf16.mxu1 %v2504_v15 }
 0x525   : > { %2003 = vmatmul.mubr.msk.bf16.vlgmr.msra.gmra.mxu1 %vm952_vm3, %v1243_v9 }
 0x526   : > { %2013 = vmatpush3.bf16.msra.mxu1 %v1369_v11  ;;  %2014 = vmatprep.mubr.msk.bf16.mxu1 %vm2505_vm1, %v2504_v15 }
 0x527   : > { %2026 = vmatprep.subr.bf16.mxu1 %v2504_v15 }
 0x52d   : > { %2015 = vmatmul.mubr.msk.bf16.vlgmr.msra.gmra.mxu1 %vm952_vm3, %v1362_v13 }
 0x52e   : > { %2030 = vmatprep.mubr.msk.bf16.mxu1 %vm2505_vm1, %v2504_v15  ;;  %2027 = vmatpush3.bf16.msra.mxu1 %v2189_v55 }
 0x52f   : > { %2028 = vmatprep.subr.bf16.mxu1 %v2504_v15 }
 0x532   : > { %2029 = vmatpush3.bf16.msra.mxu1 %v2190_v56 }
 0x55c   : > { %v1053_v14 = vpop.f32.mrf.mxu1 }
 0x55d   : > { %v1059_v16 = vpack.c.bf16 %v1053_v14, %v1053_v14  ;;  %v1912_v14 = vld [vmem:[%s3056_s20] ss:$0 sm:$0xff] }
 0x55e   : > { %v1980_v17 = vpop.f32.mrf.mxu1 }
 0x55f   : > { %1061 = vst.msk [vmem:[#allocation4] sm:$0xf] %vm804_vm2, %v1059_v16 }
 0x560   : > { %v1056_v18 = vpop.f32.mrf.mxu1 }
 0x562   : > { %v1981_v19 = vpop.f32.mrf.mxu1 }
 0x5dd   : > { %v1167_v20 = vpop.f32.mrf.mxu1 }
 0x5de   : > { %v1918_v21 = vpack.c.bf16 %v1167_v20, %v1167_v20 }
 0x5df   : > { %v1992_v22 = vpop.f32.mrf.mxu1 }
 0x5e0   : > { %1177 = vrot.lane.b32.xlu1 %v1918_v21, %s2513_s0  ;;  %s687_s0 = scalar_lea.vmem [#allocation17], %s1869_s8 }
 0x5e1   : > { %v1170_v23 = vpop.f32.mrf.mxu1  ;;  %s1688_s3 = sshll.u32 %s687_s0, 4  ;;  %s2949_s3 = int_to_ptr.vmem [resolvable:$true] %s1688_s3 }
 0x5e2   : > { %p2408_p4 = scmp.lt.s32.totalorder %s2949_s3, %s2406_s4 }
 0x5e3   : > { %v1993_v24 = vpop.f32.mrf.mxu1 }
 0x5e5   : > { %v1286_v26 = vpop.f32.mrf.mxu1 }
 0x5e6   : > { %v1919_v28 = vpack.c.bf16 %v1286_v26, %v1286_v26 }
 0x5e7   : > { %v2004_v29 = vpop.f32.mrf.mxu1 }
 0x5e8   : > { %1296 = vrot.lane.b32.xlu1 %v1919_v28, %s2514_s22  ;;  %s2947_s22 = scalar_lea.hbm %s3057_s30, %s1914_s17 }
 0x5e9   : > { %v1289_v30 = vpop.f32.mrf.mxu1 }
 0x5eb   : > { %v2005_v31 = vpop.f32.mrf.mxu1 }
 0x5ed   : > { %v1405_v32 = vpop.f32.mrf.mxu1 }
 0x5ee   : > { %v1920_v33 = vpack.c.bf16 %v1405_v32, %v1405_v32 }
 0x5ef   : > { %v2016_v34 = vpop.f32.mrf.mxu1 }
 0x5f0   : > { %1415 = vrot.lane.b32.xlu0 %v1920_v33, %s2515_s14  ;;  %s2401_s14 = scalar_lea.vmem %s2949_s3, 128 }
 0x5f1   : > { %v1408_v35 = vpop.f32.mrf.mxu1  ;;  %p2402_p3 = scmp.ne.s32.totalorder %s2949_s3, %s2401_s14  ;;  %p2409_p0 = scmp.lt.s32.totalorder %s2407_s7, %s2401_s14 }
 0x5f3   : > { %v2017_v36 = vpop.f32.mrf.mxu1  ;;  %p2403_p7 = pnand %p2402_p3, %p2739_p9  ;;  %p2410_p6 = por %p2409_p0, %p2408_p4 }
 0x5f5   : > { %p2404_p1 = pneg %p2403_p7 }
 0x5f7   : > { %p2411_p2 = pnand %p2410_p6, %p2404_p1 }
 0x652   : > { %v1178_v37 = vpop.permute.xlu1 %1177 }
 0x653   : > { %1181 = vst.msk [vmem:[#allocation4] sm:$0xf] %vm1180_vm5, %v1178_v37 }
 0x65a   : > { %v1297_v38 = vpop.permute.xlu1 %1296 }
 0x65b   : > { %1300 = vst.msk [vmem:[#allocation4] sm:$0xf] %vm1299_vm6, %v1297_v38 }
 0x662   : > { %v1416_v39 = vpop.permute.xlu0 %1415 }
 0x663   : > { %1419 = vst.msk [vmem:[#allocation4] sm:$0xf] %vm1418_vm7, %v1416_v39 }
 0x66a   : > { %v1420_v40 = vld [vmem:[#allocation4] sm:$0xf] }
 0x66b   : > { %2023 = vmatmul.mubr.msk.bf16.vlgmr.msra.gmra.mxu0 %vm707_vm0, %v1420_v40 }
 0x66c   : > { %2042 = vmatprep.mubr.msk.bf16.mxu0 %vm2505_vm1, %v2504_v15 }
 0x72b   : > { %v1474_v42 = vpop.f32.mrf.mxu0 }
 0x72c   : > { %v1480_v44 = vadd.f32 %v1474_v42, %v2797_v1  ;;  %v2191_v1 = vld [vmem:[%s3011_s15 + $0x18] sm:$0xff]  }
 0x72d   : > { %v2024_v45 = vpop.f32.mrf.mxu0  ;;  %2035 = vmatpush3.bf16.msra.mxu0 %v2191_v1 }
 0x72e   : > { %v1488_v46 = vadd.f32 %v1900_v43, %v1480_v44  ;;  %2036 = vmatprep.subr.bf16.mxu0 %v2504_v15 }
 0x72f   : > { %v1477_v47 = vpop.f32.mrf.mxu0 }
 0x730   : > { %v1491_v48 = vsel %vm707_vm0, %v1488_v46, 0.0 }
 0x731   : > { %1492 = vadd.xlane.f32.xlu1 %v1491_v48  ;;  %v2025_v49 = vpop.f32.mrf.mxu0  ;;  %2037 = vmatpush3.bf16.msra.mxu0 %v2192_v57 }
 0x732   : > { %2038 = vmatprep.subr.bf16.mxu0 %v2504_v15 }
 0x735   : > { %2039 = vmatpush3.bf16.msra.mxu0 %v2193_v4 }
 0x736   : > { %2040 = vmatprep.subr.bf16.mxu0 %v2504_v15 }
 0x739   : > { %2041 = vmatpush3.bf16.msra.mxu0 %v2194_v5 }
 0x7ba   : > { %v1493_v50 = vpop.xlane.xlu1 %1492 }
 0x7bb   : > { %v1494_v51 = vmul.f32 0.03125, %v1493_v50 }
 0x7bd   : > { %v1495_v52 = vsub.f32 %v1488_v46, %v1494_v51 }
 0x7bf   : > { %v1496_v53 = vmul.f32 %v1495_v52, %v1495_v52 }
 0x7c1   : > { %v1497_v54 = vsel %vm707_vm0, %v1496_v53, 0.0 }
 0x7c2   : > { %1498 = vadd.xlane.f32.xlu0 %v1497_v54 }
 0x84b   : > { %v1499_v58 = vpop.xlane.xlu0 %1498 }
 0x84c   : > { %v1500_v59 = vmul.f32 0.03125, %v1499_v58 }
 0x84e   : > { %v1501_v60 = vadd.f32 1e-05, %v1500_v59 }
 0x850   : > { %2215 = vrsqrt.f32 %v1501_v60 }
 0x85d   : > { %v2216_v61 = vpop.eup %2215 }
 0x85e   : > { %v1503_v41 = vmul.f32 %v2216_v61, %v1495_v52 }
 0x860   : > { %v1510_v0 = vmul.f32 %v1901_v62, %v1503_v41 }
 0x862   : > { %v1517_v2 = vadd.f32 %v1902_v63, %v1510_v0 }
 0x864   : > { %v1518_v3 = vpack.c.bf16 %v1517_v2, %v1517_v2 }
 0x866   : > { %2031 = vmatmul.mubr.msk.bf16.vlgmr.msra.gmra.mxu1 %vm707_vm0, %v1518_v3 }
 0x926   : > { %v1579_v7 = vpop.f32.mrf.mxu1 }
 0x927   : > { %v1580_v8 = vadd.f32 %v1903_v6, %v1579_v7 }
 0x928   : > { %v2032_v9 = vpop.f32.mrf.mxu1 }
 0x929   : > { %v1585_v10 = vmax.f32 %v1580_v8, 0.0 }
 0x92a   : > { %v1582_v11 = vpop.f32.mrf.mxu1 }
 0x92b   : > { %v1586_v12 = vpack.c.bf16 %v1585_v10, %v1585_v10 }
 0x92c   : > { %v2033_v13 = vpop.f32.mrf.mxu1 }
 0x92d   : > { %2043 = vmatmul.mubr.msk.bf16.vlgmr.msra.gmra.mxu0 %vm1619_vm8, %v1586_v12 }
 0x9ed   : > { %v1657_v15 = vpop.f32.mrf.mxu0 }
 0x9ee   : > { %v1663_v16 = vadd.f32 %v1657_v15, %v1488_v46 }
 0x9ef   : > { %v2044_v17 = vpop.f32.mrf.mxu0 }
 0x9f0   : > { %v1671_v18 = vadd.f32 %v1912_v14, %v1663_v16 }
 0x9f1   : > { %v1660_v19 = vpop.f32.mrf.mxu0 }
 0x9f2   : > { %1672 = vst.msk [vmem:[%s687_s0] sm:$0xff] %vm707_vm0, %v1671_v18 }
 0x9f3   : > { %v2045_v20 = vpop.f32.mrf.mxu0 }
 0x9f4   : > { %2414 = shalt.err (!%p2411_p2)
}
 0x9f5   : > { %s2415_s8 = scalar_lea.hbm %s2947_s22, 128  ;;  %s2419_s18 = scalar_lea.hbm %s3057_s30, 256 }
 0x9f6   : > { %p2416_p5 = scmp.ne.s32.totalorder %s2947_s22, %s2415_s8  ;;  %p2420_p12 = scmp.lt.s32.totalorder %s2947_s22, %s3057_s30 }
 0x9f7   : > { %p2421_p8 = scmp.lt.s32.totalorder %s2419_s18, %s2415_s8 }
 0x9f8   : > { %p2417_p10 = pnand %p2416_p5, %p2739_p9 }
 0x9f9   : > { %p2422_p3 = por %p2421_p8, %p2420_p12 }
 0x9fa   : > { %p2418_p13 = pneg %p2417_p10 }
 0x9fc   : > { %p2423_p7 = pnand %p2422_p3, %p2418_p13 }
 0x9fe   : > { %2426 = shalt.err (!%p2423_p7)
}
 0x9ff   : > { %2072 = dma.vmem_to_hbm [thread:$0]  (%p2739_p9), %s2949_s3, 128, %s2947_s22, %s1674_s27  }
 0xa00 PF: > { %s1700_s0 = sand.u32 1, %s2473_s24   ;;  %p3058_p1 = scmp.ge.s32.totalorder %s2493_s29, 2 }
 0xa01   : > { %s1701_s1 = scalar_lea.sflag [#allocation7], %s1700_s0 }
 0xa02   : > { %p2098_p4 = pnand %p3058_p1, %p2746_p11 }
 0xa04   : > { %p2099_p0 = pneg %p2098_p4 }
 0xa06   : > { %2468 = dma.done.wait (%p2099_p0), %s1701_s1, 128  }
 0xa07   : > { %2470 = vsyncadd (%p2099_p0), %s1701_s1, 4294967168  ;;  %s36_s29 = sadd.s32 1, %s2493_s29   ;;  %s3059_s23 = sld [smem:[#allocation23_spill]] }
 0xa08   : > { %p33_p6 = scmp.ge.s32.totalorder %s36_s29, 4   ;;  %s3060_s24 = smov %s2477_s25 }
 0xa09   : > { %s3061_s25 = smov %s2481_s26  ;;  %s3062_s26 = smov %s2744_s16 }
 0xa0a   : > { %s3063_s27 = smov %s2489_s28  ;;  %35 = sbr.rel (!%p33_p6) target bundleno = 22 (0x16), region = 179 }
 0xa0d   : > { %s3064_s28 = smov %s3059_s23 }
 0xa0f   :  { %1706 = vsyncpa [#allocation6], 1 }
 0xa10   :  { %1708 = vsyncpa [#allocation6 + $0x1], 1 }
 0xa11   :  { %1709 = vsyncpa [#allocation9], 1 }
 0xa12   :  { %1710 = vsyncpa [#allocation12], 1 }
 0xa13   :  { %1711 = vsyncpa [#allocation15], 1 }
 0xa14   :  { %1712 = vsyncpa [#allocation7], 1 }
 0xa15   :  { %1714 = vsyncpa [#allocation7 + $0x1], 1 }

</bundles_post_ra>
